<compile_context>
chip_gen: v7x
topology: tpu7x:2x2x1
jax: 0.10.0
libtpu: 0.0.40
codegen_flags: <defaults>
</compile_context>

<pallas_src>
import numpy as np
import jax
import jax.numpy as jnp
from jax import lax
from jax.experimental import pallas as pl
from jax.experimental.pallas import tpu as pltpu

MAX_POSSIBLE_GAIN = 1.2
_TANH_SCALE = (MAX_POSSIBLE_GAIN - 0.0) / 2.0        # 0.6
_TANH_BIAS = 0.0 - _TANH_SCALE * (-1.0)              # 0.6


def _round_up(x, m):
    return ((x + m - 1) // m) * m


def _choose_b_tile(batch, hw, lane_cap=2048):
    """Largest divisor of `batch` whose lane width fits `lane_cap`.

    When the batch is big enough, keep >= 2 grid steps (so
    dimension_semantics=("parallel",) can shard across v7x's two TensorCores)
    while still amortizing per-step overhead over >= 2 images per step.
    """
    divs = [d for d in range(1, batch + 1)
            if batch % d == 0 and d * hw <= lane_cap]
    if not divs:
        return 1
    multi = [d for d in divs if d >= 2 and batch // d >= 2]
    return max(multi) if multi else max(divs)


# ------------------------- parameter packing (once) -------------------------

def pack_params(params, in_channels, img_h, img_w, b_tile):
    """Fold / pad / concatenate all constants once, at parameter-build time."""
    hw = img_h * img_w
    L = b_tile * hw

    p = np.arange(hw)
    row_i = p // img_w
    col_i = p % img_w

    conv_meta, lin_meta = [], []
    w_segs, b_segs, mask_rows = [], [], []
    row_off = 0
    mask_row = 0
    cur_c, cur_h, cur_w, f = in_channels, img_h, img_w, 1
    max_kkc = 8

    for (w_oihw, bn_scale, bn_bias, k, stride) in params["blocks"]:
        w_oihw = np.asarray(w_oihw, np.float32)
        bn_scale = np.asarray(bn_scale, np.float32)
        bn_bias = np.asarray(bn_bias, np.float32)
        cout = w_oihw.shape[0]
        pad = (k - 1) // 2
        cin_pad = _round_up(cur_c, 8)
        cout_pad = _round_up(cout, 8)
        kkc = k * k * cin_pad
        max_kkc = max(max_kkc, kkc)

        # BN-scale-folded, channel-padded weight matrix (cout_pad, k*k*cin_pad)
        # with column order (kh, kw, ci_pad) matching the in-kernel RHS rows.
        w_p = np.zeros((cout_pad, k, k, cin_pad), np.float32)
        w_p[:cout, :, :, :cur_c] = np.transpose(w_oihw, (0, 2, 3, 1))
        w_p[:cout] *= bn_scale[:, None, None, None]
        w_segs.append(w_p.reshape(cout_pad, kkc))
        b_seg = np.zeros((cout_pad, 1), np.float32)
        b_seg[:cout, 0] = bn_bias
        b_segs.append(b_seg)

        # Precomputed per-tap roll amounts and boundary masks (hoisted out of
        # the kernel).  Masks also kill cross-image roll wraparound.
        taps = []
        for kh in range(k):
            for kw in range(k):
                dh, dw = kh - pad, kw - pad
                shift = dh * f * img_w + dw * f
                hh = row_i + dh * f
                ww = col_i + dw * f
                m = ((hh >= 0) & (hh < cur_h * f) &
                     (ww >= 0) & (ww < cur_w * f)).astype(np.float32)
                all_ones = bool(m.min() > 0.5)
                mask_rows.append(np.tile(m, b_tile))
                taps.append(dict(t=kh * k + kw, roll=(-shift) % L,
                                 mask_row=mask_row, all_ones=all_ones))
                mask_row += 1

        # conv geometry (stride, pad=(k-1)//2) then MaxPool2d(2, 2)
        h_conv = (cur_h + 2 * pad - k) // stride + 1
        w_conv = (cur_w + 2 * pad - k) // stride + 1
        f_conv = f * stride
        assert h_conv * f_conv <= img_h and w_conv * f_conv <= img_w, (
            "conv output does not fit in the lane frame for this config")
        conv_meta.append(dict(row_off=row_off, cin_pad=cin_pad,
                              cout_pad=cout_pad, kkc=kkc, taps=taps, fc=f_conv))
        row_off += cout_pad
        cur_h, cur_w = h_conv // 2, w_conv // 2
        assert cur_h >= 1 and cur_w >= 1
        f = f_conv * 2
        cur_c = cout

    # Linear / ReLU stack (PyTorch (out, in) layout), dims padded to 8.
    in_pad = _round_up(cur_c, 8)
    n_lin = len(params["linears"])
    out_dim = None
    for idx, (w, b) in enumerate(params["linears"]):
        w = np.asarray(w, np.float32)
        b = np.asarray(b, np.float32)
        o_d, i_d = w.shape
        o_pad = _round_up(o_d, 8)
        w_seg = np.zeros((o_pad, in_pad), np.float32)
        w_seg[:o_d, :i_d] = w
        b_seg = np.zeros((o_pad, 1), np.float32)
        b_seg[:o_d, 0] = b
        w_segs.append(w_seg)
        b_segs.append(b_seg)
        lin_meta.append(dict(row_off=row_off, in_pad=in_pad, out_pad=o_pad,
                             last=(idx == n_lin - 1)))
        row_off += o_pad
        in_pad = o_pad
        out_dim = o_d

    # Collapse all tiny constants into two row-stacked arrays (+ masks + pool).
    n_cols = _round_up(max(s.shape[1] for s in w_segs), 128)
    w_all = np.zeros((row_off, n_cols), np.float32)
    r = 0
    for s in w_segs:
        w_all[r:r + s.shape[0], :s.shape[1]] = s
        r += s.shape[0]
    b_all = np.concatenate(b_segs, axis=0)
    mask_all = np.stack(mask_rows, axis=0)                      # (taps, L)

    # AdaptiveAvgPool2d((1,1)) + Flatten as ONE matmul: per-image masked mean
    # over the valid frame positions (block-diagonal pool matrix).
    final_mask = ((row_i % f == 0) & (row_i < cur_h * f) &
                  (col_i % f == 0) & (col_i < cur_w * f)).astype(np.float32)
    final_mask /= float(cur_h * cur_w)
    pool_mat = np.zeros((L, b_tile), np.float32)
    for b_i in range(b_tile):
        pool_mat[b_i * hw:(b_i + 1) * hw, b_i] = final_mask

    return dict(
        w_all=jnp.asarray(w_all), b_all=jnp.asarray(b_all),
        mask_all=jnp.asarray(mask_all), pool_mat=jnp.asarray(pool_mat),
        conv_meta=conv_meta, lin_meta=lin_meta,
        cin_pad0=_round_up(in_channels, 8), out_dim=out_dim,
        max_kkc=max_kkc, img_h=img_h, img_w=img_w, b_tile=b_tile, hw=hw)


# ------------------------------ fused kernel ------------------------------

def _make_kernel(packed):
    conv_meta = packed["conv_meta"]
    lin_meta = packed["lin_meta"]
    img_w = packed["img_w"]
    out_dim = packed["out_dim"]
    L = packed["b_tile"] * packed["hw"]

    def kernel(x_ref, w_ref, b_ref, mask_ref, pool_ref, o_ref, rhs_ref):
        act = x_ref[...]                                   # (cin_pad0, L)
        for blk in conv_meta:
            cin_pad, cout_pad, kkc = blk["cin_pad"], blk["cout_pad"], blk["kkc"]
            ro = blk["row_off"]

            # ---- in-register im2col: K*K rolled (+masked) taps -> scratch RHS
            #      (tap slots are cin_pad=8k rows -> 8-aligned sublane stores)
            for tap in blk["taps"]:
                t = act if tap["roll"] == 0 else pltpu.roll(
                    act, shift=tap["roll"], axis=1)
                if not tap["all_ones"]:
                    t = t * mask_ref[pl.ds(tap["mask_row"], 1), :]
                rhs_ref[pl.ds(tap["t"] * cin_pad, cin_pad), :] = t

            # ---- conv (+ folded BN scale) = ONE lane-dense MXU matmul
            y = jnp.dot(w_ref[pl.ds(ro, cout_pad), pl.ds(0, kkc)],
                        rhs_ref[pl.ds(0, kkc), :],
                        preferred_element_type=jnp.float32)
            # ---- BN bias + ReLU
            y = jnp.maximum(y + b_ref[pl.ds(ro, cout_pad), :], 0.0)

            # ---- separable 2x2 / stride-2 max-pool, kept sparse in the frame
            fc = blk["fc"]
            m = jnp.maximum(y, pltpu.roll(y, shift=(L - fc) % L, axis=1))
            act = jnp.maximum(
                m, pltpu.roll(m, shift=(L - fc * img_w) % L, axis=1))

        # ---- AdaptiveAvgPool2d((1,1)) + Flatten: per-image masked mean as
        #      one matmul against the precomputed block-diagonal pool matrix.
        h = jnp.dot(act, pool_ref[...],
                    preferred_element_type=jnp.float32)     # (C_pad, B_TILE)

        # ---- Linear / ReLU stack + ScaledTanh(0, 1.2)
        for lm in lin_meta:
            ro, ip, op = lm["row_off"], lm["in_pad"], lm["out_pad"]
            h = jnp.dot(w_ref[pl.ds(ro, op), pl.ds(0, ip)], h,
                        preferred_element_type=jnp.float32)
            h = h + b_ref[pl.ds(ro, op), :]
            if not lm["last"]:
                h = jnp.maximum(h, 0.0)
        o_ref[0] = jnp.tanh(h[:out_dim, :]) * _TANH_SCALE + _TANH_BIAS

    return kernel


# --------------------------------- wrapper ---------------------------------

def deep_awb_forward(x_nchw, packed):
    """Forward pass.  x_nchw: (B, Cin, H, W) like the PyTorch module."""
    x = jnp.asarray(x_nchw, jnp.float32)
    bsz, cin, img_h, img_w = x.shape
    assert img_h == packed["img_h"] and img_w == packed["img_w"]
    hw = img_h * img_w
    b_tile = packed["b_tile"]
    assert bsz % b_tile == 0, "batch must be divisible by the packed B_TILE"
    n_tiles = bsz // b_tile
    L = b_tile * hw
    cin_pad0 = packed["cin_pad0"]
    out_dim = packed["out_dim"]

    # Lane-dense layout: channels on sublanes, (image, row, col) on lanes.
    x_flat = jnp.transpose(x, (1, 0, 2, 3)).reshape(cin, bsz * hw)
    if cin_pad0 > cin:
        x_flat = jnp.pad(x_flat, ((0, cin_pad0 - cin), (0, 0)))

    kernel = _make_kernel(packed)

    def _const_spec(arr):
        return pl.BlockSpec(arr.shape, lambda i: (0, 0))

    out = pl.pallas_call(
        kernel,
        out_shape=jax.ShapeDtypeStruct((n_tiles, out_dim, b_tile), jnp.float32),
        grid_spec=pltpu.PrefetchScalarGridSpec(
            num_scalar_prefetch=0,
            grid=(n_tiles,),
            in_specs=[
                pl.BlockSpec((cin_pad0, L), lambda i: (0, i)),
                _const_spec(packed["w_all"]),
                _const_spec(packed["b_all"]),
                _const_spec(packed["mask_all"]),
                _const_spec(packed["pool_mat"]),
            ],
            out_specs=pl.BlockSpec((1, out_dim, b_tile), lambda i: (i, 0, 0)),
            scratch_shapes=[pltpu.VMEM((packed["max_kkc"], L), jnp.float32)],
        ),
        compiler_params=pltpu.CompilerParams(
            dimension_semantics=("parallel",)),
    )(x_flat, packed["w_all"], packed["b_all"], packed["mask_all"],
      packed["pool_mat"])

    # (tiles, out_dim, B_TILE) -> (B, out_dim), matching input batch order.
    return jnp.transpose(out, (0, 2, 1)).reshape(bsz, out_dim)


# --------------------------------- params ---------------------------------

def init_params(key, block_configs, hidden_neurons, in_channels=3):
    """Deterministic parameters.  Conv weights in PyTorch OIHW layout,
    Linear weights in PyTorch (out, in) layout.  BatchNorm folded (eval)."""
    params = {"blocks": [], "linears": []}
    cin = in_channels
    eps = 1e-5
    for (n_kernels, ksize, stride) in block_configs:
        key, k_w, k_g, k_b, k_m, k_v = jax.random.split(key, 6)
        w = jax.random.normal(k_w, (n_kernels, cin, ksize, ksize),
                              jnp.float32) * 0.12
        gamma = 1.0 + 0.1 * jax.random.normal(k_g, (n_kernels,), jnp.float32)
        beta = 0.1 * jax.random.normal(k_b, (n_kernels,), jnp.float32)
        running_mean = 0.05 * jax.random.normal(k_m, (n_kernels,), jnp.float32)
        running_var = 1.0 + 0.1 * jax.random.uniform(k_v, (n_kernels,),
                                                     jnp.float32)
        scale = gamma / jnp.sqrt(running_var + eps)
        bias = beta - running_mean * scale
        params["blocks"].append((w, scale, bias, ksize, stride))
        cin = n_kernels
    dims = [cin] + list(hidden_neurons)
    for i in range(len(hidden_neurons)):
        key, k_w, k_b = jax.random.split(key, 3)
        w = jax.random.normal(k_w, (dims[i + 1], dims[i]),
                              jnp.float32) / np.sqrt(dims[i])
        bias = 0.05 * jax.random.normal(k_b, (dims[i + 1],), jnp.float32)
        params["linears"].append((w, bias))
    return params


# ---------------------------- pure-JAX reference ----------------------------

def reference_forward(x_nchw, params):
    x = jnp.transpose(x_nchw, (0, 2, 3, 1)).astype(jnp.float32)   # NHWC
    for (w_oihw, scale, bias, k, stride) in params["blocks"]:
        w_hwio = jnp.transpose(w_oihw, (2, 3, 1, 0))
        p = (k - 1) // 2
        y = lax.conv_general_dilated(
            x, w_hwio, (stride, stride), [(p, p), (p, p)],
            dimension_numbers=("NHWC", "HWIO", "NHWC"),
            precision=lax.Precision.HIGHEST)
        y = jnp.maximum(y * scale.reshape(1, 1, 1, -1)
                        + bias.reshape(1, 1, 1, -1), 0.0)
        x = lax.reduce_window(y, -jnp.inf, lax.max,
                              (1, 2, 2, 1), (1, 2, 2, 1), "VALID")
    h = jnp.mean(x, axis=(1, 2))
    n = len(params["linears"])
    for i, (w, b) in enumerate(params["linears"]):
        h = jnp.dot(h, w.T, precision=lax.Precision.HIGHEST) + b
        if i < n - 1:
            h = jnp.maximum(h, 0.0)
    return jnp.tanh(h) * _TANH_SCALE + _TANH_BIAS


if __name__ == "__main__":
    # block_configs: (n_kernels, kernel_size, stride); hidden_neurons per
    # RegressionBuilder (last entry = output dim).  Input channels = 3 (spec).
    block_configs = [(8, 3, 1), (16, 3, 1)]
    hidden_neurons = [32, 2]

    key = jax.random.PRNGKey(0)
    key, k_x, k_p = jax.random.split(key, 3)
    params = init_params(k_p, block_configs, hidden_neurons, in_channels=3)

    B, C, H, W = 2, 3, 16, 16
    x = jax.random.normal(k_x, (B, C, H, W), jnp.float32)   # NCHW like PyTorch

    b_tile = _choose_b_tile(B, H * W)
    packed = pack_params(params, in_channels=C, img_h=H, img_w=W,
                         b_tile=b_tile)

    out = jax.block_until_ready(deep_awb_forward(x, packed))
    ref = jax.block_until_ready(reference_forward(x, params))
    # Tolerance accounts for the TPU MXU's default (reduced) f32 matmul
    # precision vs. the HIGHEST-precision pure-JAX reference.
    np.testing.assert_allclose(np.asarray(out), np.asarray(ref),
                               rtol=3e-3, atol=3e-3)
    print("KERNEL_OK")
</pallas_src>

<mosaic_0001>
module attributes {stable_mosaic.version = 11 : i64} {
  func.func @kernel(%arg0: i32, %arg1: memref<8x512xf32, #tpu.memory_space<vmem>>, %arg2: memref<64x128xf32, #tpu.memory_space<vmem>>, %arg3: memref<64x1xf32, #tpu.memory_space<vmem>>, %arg4: memref<18x512xf32, #tpu.memory_space<vmem>>, %arg5: memref<512x2xf32, #tpu.memory_space<vmem>>, %arg6: memref<1x2x2xf32, #tpu.memory_space<vmem>>, %arg7: memref<72x512xf32, #tpu.memory_space<vmem>>) attributes {dimension_semantics = [#tpu.dimension_semantics<parallel>], iteration_bounds = array<i64: 1>, scalar_prefetch = 0 : i64, scratch_operands = 1 : i64, tpu.core_type = #tpu.core_type<tc>, window_params = [{transform_indices = @transform_0, window_bounds = array<i64: 8, 512>}, {pipeline_mode = #tpu.pipeline_mode<synchronous>, transform_indices = @transform_1, window_bounds = array<i64: 64, 128>}, {pipeline_mode = #tpu.pipeline_mode<synchronous>, transform_indices = @transform_2, window_bounds = array<i64: 64, 1>}, {pipeline_mode = #tpu.pipeline_mode<synchronous>, transform_indices = @transform_3, window_bounds = array<i64: 18, 512>}, {pipeline_mode = #tpu.pipeline_mode<synchronous>, transform_indices = @transform_4, window_bounds = array<i64: 512, 2>}, {transform_indices = @transform_5, window_bounds = array<i64: 1, 2, 2>}]} {
    %c0 = arith.constant 0 : index
    %c0_0 = arith.constant 0 : index
    %0 = vector.load %arg1[%c0, %c0_0] : memref<8x512xf32, #tpu.memory_space<vmem>>, vector<8x512xf32>
    %c17_i32 = arith.constant 17 : i32
    %1 = tpu.dynamic_rotate %0 by %c17_i32 dim 1 : vector<8x512xf32>, i32 -> vector<8x512xf32>
    %c0_1 = arith.constant 0 : index
    %c0_2 = arith.constant 0 : index
    %2 = vector.load %arg4[%c0_1, %c0_2] : memref<18x512xf32, #tpu.memory_space<vmem>>, vector<1x512xf32>
    %3 = vector.broadcast %2 : vector<1x512xf32> to vector<8x512xf32>
    %4 = arith.mulf %1, %3 : vector<8x512xf32>
    %c0_3 = arith.constant 0 : index
    %c0_4 = arith.constant 0 : index
    %5 = vector.load %arg7[%c0_3, %c0_4] : memref<72x512xf32, #tpu.memory_space<vmem>>, vector<8x512xf32>
    tpu.vector_store %arg7[%c0_3, %c0_4], %4 {strides = array<i32>} : memref<72x512xf32, #tpu.memory_space<vmem>>, vector<8x512xf32>,
    %c16_i32 = arith.constant 16 : i32
    %6 = tpu.dynamic_rotate %0 by %c16_i32 dim 1 : vector<8x512xf32>, i32 -> vector<8x512xf32>
    %c1 = arith.constant 1 : index
    %c0_5 = arith.constant 0 : index
    %7 = vector.load %arg4[%c1, %c0_5] : memref<18x512xf32, #tpu.memory_space<vmem>>, vector<1x512xf32>
    %8 = vector.broadcast %7 : vector<1x512xf32> to vector<8x512xf32>
    %9 = arith.mulf %6, %8 : vector<8x512xf32>
    %c8 = arith.constant 8 : index
    %c0_6 = arith.constant 0 : index
    %10 = vector.load %arg7[%c8, %c0_6] : memref<72x512xf32, #tpu.memory_space<vmem>>, vector<8x512xf32>
    tpu.vector_store %arg7[%c8, %c0_6], %9 {strides = array<i32>} : memref<72x512xf32, #tpu.memory_space<vmem>>, vector<8x512xf32>,
    %c15_i32 = arith.constant 15 : i32
    %11 = tpu.dynamic_rotate %0 by %c15_i32 dim 1 : vector<8x512xf32>, i32 -> vector<8x512xf32>
    %c2 = arith.constant 2 : index
    %c0_7 = arith.constant 0 : index
    %12 = vector.load %arg4[%c2, %c0_7] : memref<18x512xf32, #tpu.memory_space<vmem>>, vector<1x512xf32>
    %13 = vector.broadcast %12 : vector<1x512xf32> to vector<8x512xf32>
    %14 = arith.mulf %11, %13 : vector<8x512xf32>
    %c16 = arith.constant 16 : index
    %c0_8 = arith.constant 0 : index
    %15 = vector.load %arg7[%c16, %c0_8] : memref<72x512xf32, #tpu.memory_space<vmem>>, vector<8x512xf32>
    tpu.vector_store %arg7[%c16, %c0_8], %14 {strides = array<i32>} : memref<72x512xf32, #tpu.memory_space<vmem>>, vector<8x512xf32>,
    %c1_i32 = arith.constant 1 : i32
    %16 = tpu.dynamic_rotate %0 by %c1_i32 dim 1 : vector<8x512xf32>, i32 -> vector<8x512xf32>
    %c3 = arith.constant 3 : index
    %c0_9 = arith.constant 0 : index
    %17 = vector.load %arg4[%c3, %c0_9] : memref<18x512xf32, #tpu.memory_space<vmem>>, vector<1x512xf32>
    %18 = vector.broadcast %17 : vector<1x512xf32> to vector<8x512xf32>
    %19 = arith.mulf %16, %18 : vector<8x512xf32>
    %c24 = arith.constant 24 : index
    %c0_10 = arith.constant 0 : index
    %20 = vector.load %arg7[%c24, %c0_10] : memref<72x512xf32, #tpu.memory_space<vmem>>, vector<8x512xf32>
    tpu.vector_store %arg7[%c24, %c0_10], %19 {strides = array<i32>} : memref<72x512xf32, #tpu.memory_space<vmem>>, vector<8x512xf32>,
    %c32 = arith.constant 32 : index
    %c0_11 = arith.constant 0 : index
    %21 = vector.load %arg7[%c32, %c0_11] : memref<72x512xf32, #tpu.memory_space<vmem>>, vector<8x512xf32>
    tpu.vector_store %arg7[%c32, %c0_11], %0 {strides = array<i32>} : memref<72x512xf32, #tpu.memory_space<vmem>>, vector<8x512xf32>,
    %c511_i32 = arith.constant 511 : i32
    %22 = tpu.dynamic_rotate %0 by %c511_i32 dim 1 : vector<8x512xf32>, i32 -> vector<8x512xf32>
    %c5 = arith.constant 5 : index
    %c0_12 = arith.constant 0 : index
    %23 = vector.load %arg4[%c5, %c0_12] : memref<18x512xf32, #tpu.memory_space<vmem>>, vector<1x512xf32>
    %24 = vector.broadcast %23 : vector<1x512xf32> to vector<8x512xf32>
    %25 = arith.mulf %22, %24 : vector<8x512xf32>
    %c40 = arith.constant 40 : index
    %c0_13 = arith.constant 0 : index
    %26 = vector.load %arg7[%c40, %c0_13] : memref<72x512xf32, #tpu.memory_space<vmem>>, vector<8x512xf32>
    tpu.vector_store %arg7[%c40, %c0_13], %25 {strides = array<i32>} : memref<72x512xf32, #tpu.memory_space<vmem>>, vector<8x512xf32>,
    %c497_i32 = arith.constant 497 : i32
    %27 = tpu.dynamic_rotate %0 by %c497_i32 dim 1 : vector<8x512xf32>, i32 -> vector<8x512xf32>
    %c6 = arith.constant 6 : index
    %c0_14 = arith.constant 0 : index
    %28 = vector.load %arg4[%c6, %c0_14] : memref<18x512xf32, #tpu.memory_space<vmem>>, vector<1x512xf32>
    %29 = vector.broadcast %28 : vector<1x512xf32> to vector<8x512xf32>
    %30 = arith.mulf %27, %29 : vector<8x512xf32>
    %c48 = arith.constant 48 : index
    %c0_15 = arith.constant 0 : index
    %31 = vector.load %arg7[%c48, %c0_15] : memref<72x512xf32, #tpu.memory_space<vmem>>, vector<8x512xf32>
    tpu.vector_store %arg7[%c48, %c0_15], %30 {strides = array<i32>} : memref<72x512xf32, #tpu.memory_space<vmem>>, vector<8x512xf32>,
    %c496_i32 = arith.constant 496 : i32
    %32 = tpu.dynamic_rotate %0 by %c496_i32 dim 1 : vector<8x512xf32>, i32 -> vector<8x512xf32>
    %c7 = arith.constant 7 : index
    %c0_16 = arith.constant 0 : index
    %33 = vector.load %arg4[%c7, %c0_16] : memref<18x512xf32, #tpu.memory_space<vmem>>, vector<1x512xf32>
    %34 = vector.broadcast %33 : vector<1x512xf32> to vector<8x512xf32>
    %35 = arith.mulf %32, %34 : vector<8x512xf32>
    %c56 = arith.constant 56 : index
    %c0_17 = arith.constant 0 : index
    %36 = vector.load %arg7[%c56, %c0_17] : memref<72x512xf32, #tpu.memory_space<vmem>>, vector<8x512xf32>
    tpu.vector_store %arg7[%c56, %c0_17], %35 {strides = array<i32>} : memref<72x512xf32, #tpu.memory_space<vmem>>, vector<8x512xf32>,
    %c495_i32 = arith.constant 495 : i32
    %37 = tpu.dynamic_rotate %0 by %c495_i32 dim 1 : vector<8x512xf32>, i32 -> vector<8x512xf32>
    %c8_18 = arith.constant 8 : index
    %c0_19 = arith.constant 0 : index
    %38 = vector.load %arg4[%c8_18, %c0_19] : memref<18x512xf32, #tpu.memory_space<vmem>>, vector<1x512xf32>
    %39 = vector.broadcast %38 : vector<1x512xf32> to vector<8x512xf32>
    %40 = arith.mulf %37, %39 : vector<8x512xf32>
    %c64 = arith.constant 64 : index
    %c0_20 = arith.constant 0 : index
    %41 = vector.load %arg7[%c64, %c0_20] : memref<72x512xf32, #tpu.memory_space<vmem>>, vector<8x512xf32>
    tpu.vector_store %arg7[%c64, %c0_20], %40 {strides = array<i32>} : memref<72x512xf32, #tpu.memory_space<vmem>>, vector<8x512xf32>,
    %c0_21 = arith.constant 0 : index
    %c0_22 = arith.constant 0 : index
    %42 = vector.load %arg2[%c0_21, %c0_22] : memref<64x128xf32, #tpu.memory_space<vmem>>, vector<8x72xf32>
    %c0_23 = arith.constant 0 : index
    %c0_24 = arith.constant 0 : index
    %43 = vector.load %arg7[%c0_23, %c0_24] : memref<72x512xf32, #tpu.memory_space<vmem>>, vector<72x512xf32>
    %cst = arith.constant dense<0.000000e+00> : vector<8x512xf32>
    %44 = tpu.matmul %42, %43, %cst {dimension_numbers = #tpu.dot_dimension_numbers<[1], [0], [0], [1], [0, 0, 1, 1], [], []>} : vector<8x72xf32>, vector<72x512xf32>, vector<8x512xf32> -> vector<8x512xf32>
    %c0_25 = arith.constant 0 : index
    %c0_26 = arith.constant 0 : index
    %45 = vector.load %arg3[%c0_25, %c0_26] : memref<64x1xf32, #tpu.memory_space<vmem>>, vector<8x1xf32>
    %46 = vector.broadcast %45 : vector<8x1xf32> to vector<8x512xf32>
    %47 = arith.addf %44, %46 : vector<8x512xf32>
    %cst_27 = arith.constant 0.000000e+00 : f32
    %48 = vector.broadcast %cst_27 : f32 to vector<8x512xf32>
    %49 = arith.maximumf %47, %48 : vector<8x512xf32>
    %c511_i32_28 = arith.constant 511 : i32
    %50 = tpu.dynamic_rotate %49 by %c511_i32_28 dim 1 : vector<8x512xf32>, i32 -> vector<8x512xf32>
    %51 = arith.maximumf %49, %50 : vector<8x512xf32>
    %c496_i32_29 = arith.constant 496 : i32
    %52 = tpu.dynamic_rotate %51 by %c496_i32_29 dim 1 : vector<8x512xf32>, i32 -> vector<8x512xf32>
    %53 = arith.maximumf %51, %52 : vector<8x512xf32>
    %c34_i32 = arith.constant 34 : i32
    %54 = tpu.dynamic_rotate %53 by %c34_i32 dim 1 : vector<8x512xf32>, i32 -> vector<8x512xf32>
    %c9 = arith.constant 9 : index
    %c0_30 = arith.constant 0 : index
    %55 = vector.load %arg4[%c9, %c0_30] : memref<18x512xf32, #tpu.memory_space<vmem>>, vector<1x512xf32>
    %56 = vector.broadcast %55 : vector<1x512xf32> to vector<8x512xf32>
    %57 = arith.mulf %54, %56 : vector<8x512xf32>
    %c0_31 = arith.constant 0 : index
    %c0_32 = arith.constant 0 : index
    %58 = vector.load %arg7[%c0_31, %c0_32] : memref<72x512xf32, #tpu.memory_space<vmem>>, vector<8x512xf32>
    tpu.vector_store %arg7[%c0_31, %c0_32], %57 {strides = array<i32>} : memref<72x512xf32, #tpu.memory_space<vmem>>, vector<8x512xf32>,
    %c32_i32 = arith.constant 32 : i32
    %59 = tpu.dynamic_rotate %53 by %c32_i32 dim 1 : vector<8x512xf32>, i32 -> vector<8x512xf32>
    %c10 = arith.constant 10 : index
    %c0_33 = arith.constant 0 : index
    %60 = vector.load %arg4[%c10, %c0_33] : memref<18x512xf32, #tpu.memory_space<vmem>>, vector<1x512xf32>
    %61 = vector.broadcast %60 : vector<1x512xf32> to vector<8x512xf32>
    %62 = arith.mulf %59, %61 : vector<8x512xf32>
    %c8_34 = arith.constant 8 : index
    %c0_35 = arith.constant 0 : index
    %63 = vector.load %arg7[%c8_34, %c0_35] : memref<72x512xf32, #tpu.memory_space<vmem>>, vector<8x512xf32>
    tpu.vector_store %arg7[%c8_34, %c0_35], %62 {strides = array<i32>} : memref<72x512xf32, #tpu.memory_space<vmem>>, vector<8x512xf32>,
    %c30_i32 = arith.constant 30 : i32
    %64 = tpu.dynamic_rotate %53 by %c30_i32 dim 1 : vector<8x512xf32>, i32 -> vector<8x512xf32>
    %c11 = arith.constant 11 : index
    %c0_36 = arith.constant 0 : index
    %65 = vector.load %arg4[%c11, %c0_36] : memref<18x512xf32, #tpu.memory_space<vmem>>, vector<1x512xf32>
    %66 = vector.broadcast %65 : vector<1x512xf32> to vector<8x512xf32>
    %67 = arith.mulf %64, %66 : vector<8x512xf32>
    %c16_37 = arith.constant 16 : index
    %c0_38 = arith.constant 0 : index
    %68 = vector.load %arg7[%c16_37, %c0_38] : memref<72x512xf32, #tpu.memory_space<vmem>>, vector<8x512xf32>
    tpu.vector_store %arg7[%c16_37, %c0_38], %67 {strides = array<i32>} : memref<72x512xf32, #tpu.memory_space<vmem>>, vector<8x512xf32>,
    %c2_i32 = arith.constant 2 : i32
    %69 = tpu.dynamic_rotate %53 by %c2_i32 dim 1 : vector<8x512xf32>, i32 -> vector<8x512xf32>
    %c12 = arith.constant 12 : index
    %c0_39 = arith.constant 0 : index
    %70 = vector.load %arg4[%c12, %c0_39] : memref<18x512xf32, #tpu.memory_space<vmem>>, vector<1x512xf32>
    %71 = vector.broadcast %70 : vector<1x512xf32> to vector<8x512xf32>
    %72 = arith.mulf %69, %71 : vector<8x512xf32>
    %c24_40 = arith.constant 24 : index
    %c0_41 = arith.constant 0 : index
    %73 = vector.load %arg7[%c24_40, %c0_41] : memref<72x512xf32, #tpu.memory_space<vmem>>, vector<8x512xf32>
    tpu.vector_store %arg7[%c24_40, %c0_41], %72 {strides = array<i32>} : memref<72x512xf32, #tpu.memory_space<vmem>>, vector<8x512xf32>,
    %c32_42 = arith.constant 32 : index
    %c0_43 = arith.constant 0 : index
    %74 = vector.load %arg7[%c32_42, %c0_43] : memref<72x512xf32, #tpu.memory_space<vmem>>, vector<8x512xf32>
    tpu.vector_store %arg7[%c32_42, %c0_43], %53 {strides = array<i32>} : memref<72x512xf32, #tpu.memory_space<vmem>>, vector<8x512xf32>,
    %c510_i32 = arith.constant 510 : i32
    %75 = tpu.dynamic_rotate %53 by %c510_i32 dim 1 : vector<8x512xf32>, i32 -> vector<8x512xf32>
    %c14 = arith.constant 14 : index
    %c0_44 = arith.constant 0 : index
    %76 = vector.load %arg4[%c14, %c0_44] : memref<18x512xf32, #tpu.memory_space<vmem>>, vector<1x512xf32>
    %77 = vector.broadcast %76 : vector<1x512xf32> to vector<8x512xf32>
    %78 = arith.mulf %75, %77 : vector<8x512xf32>
    %c40_45 = arith.constant 40 : index
    %c0_46 = arith.constant 0 : index
    %79 = vector.load %arg7[%c40_45, %c0_46] : memref<72x512xf32, #tpu.memory_space<vmem>>, vector<8x512xf32>
    tpu.vector_store %arg7[%c40_45, %c0_46], %78 {strides = array<i32>} : memref<72x512xf32, #tpu.memory_space<vmem>>, vector<8x512xf32>,
    %c482_i32 = arith.constant 482 : i32
    %80 = tpu.dynamic_rotate %53 by %c482_i32 dim 1 : vector<8x512xf32>, i32 -> vector<8x512xf32>
    %c15 = arith.constant 15 : index
    %c0_47 = arith.constant 0 : index
    %81 = vector.load %arg4[%c15, %c0_47] : memref<18x512xf32, #tpu.memory_space<vmem>>, vector<1x512xf32>
    %82 = vector.broadcast %81 : vector<1x512xf32> to vector<8x512xf32>
    %83 = arith.mulf %80, %82 : vector<8x512xf32>
    %c48_48 = arith.constant 48 : index
    %c0_49 = arith.constant 0 : index
    %84 = vector.load %arg7[%c48_48, %c0_49] : memref<72x512xf32, #tpu.memory_space<vmem>>, vector<8x512xf32>
    tpu.vector_store %arg7[%c48_48, %c0_49], %83 {strides = array<i32>} : memref<72x512xf32, #tpu.memory_space<vmem>>, vector<8x512xf32>,
    %c480_i32 = arith.constant 480 : i32
    %85 = tpu.dynamic_rotate %53 by %c480_i32 dim 1 : vector<8x512xf32>, i32 -> vector<8x512xf32>
    %c16_50 = arith.constant 16 : index
    %c0_51 = arith.constant 0 : index
    %86 = vector.load %arg4[%c16_50, %c0_51] : memref<18x512xf32, #tpu.memory_space<vmem>>, vector<1x512xf32>
    %87 = vector.broadcast %86 : vector<1x512xf32> to vector<8x512xf32>
    %88 = arith.mulf %85, %87 : vector<8x512xf32>
    %c56_52 = arith.constant 56 : index
    %c0_53 = arith.constant 0 : index
    %89 = vector.load %arg7[%c56_52, %c0_53] : memref<72x512xf32, #tpu.memory_space<vmem>>, vector<8x512xf32>
    tpu.vector_store %arg7[%c56_52, %c0_53], %88 {strides = array<i32>} : memref<72x512xf32, #tpu.memory_space<vmem>>, vector<8x512xf32>,
    %c478_i32 = arith.constant 478 : i32
    %90 = tpu.dynamic_rotate %53 by %c478_i32 dim 1 : vector<8x512xf32>, i32 -> vector<8x512xf32>
    %c17 = arith.constant 17 : index
    %c0_54 = arith.constant 0 : index
    %91 = vector.load %arg4[%c17, %c0_54] : memref<18x512xf32, #tpu.memory_space<vmem>>, vector<1x512xf32>
    %92 = vector.broadcast %91 : vector<1x512xf32> to vector<8x512xf32>
    %93 = arith.mulf %90, %92 : vector<8x512xf32>
    %c64_55 = arith.constant 64 : index
    %c0_56 = arith.constant 0 : index
    %94 = vector.load %arg7[%c64_55, %c0_56] : memref<72x512xf32, #tpu.memory_space<vmem>>, vector<8x512xf32>
    tpu.vector_store %arg7[%c64_55, %c0_56], %93 {strides = array<i32>} : memref<72x512xf32, #tpu.memory_space<vmem>>, vector<8x512xf32>,
    %c8_57 = arith.constant 8 : index
    %c0_58 = arith.constant 0 : index
    %95 = vector.load %arg2[%c8_57, %c0_58] : memref<64x128xf32, #tpu.memory_space<vmem>>, vector<16x72xf32>
    %c0_59 = arith.constant 0 : index
    %c0_60 = arith.constant 0 : index
    %96 = vector.load %arg7[%c0_59, %c0_60] : memref<72x512xf32, #tpu.memory_space<vmem>>, vector<72x512xf32>
    %cst_61 = arith.constant dense<0.000000e+00> : vector<16x512xf32>
    %97 = tpu.matmul %95, %96, %cst_61 {dimension_numbers = #tpu.dot_dimension_numbers<[1], [0], [0], [1], [0, 0, 1, 1], [], []>} : vector<16x72xf32>, vector<72x512xf32>, vector<16x512xf32> -> vector<16x512xf32>
    %c8_62 = arith.constant 8 : index
    %c0_63 = arith.constant 0 : index
    %98 = vector.load %arg3[%c8_62, %c0_63] : memref<64x1xf32, #tpu.memory_space<vmem>>, vector<16x1xf32>
    %99 = vector.broadcast %98 : vector<16x1xf32> to vector<16x512xf32>
    %100 = arith.addf %97, %99 : vector<16x512xf32>
    %cst_64 = arith.constant 0.000000e+00 : f32
    %101 = vector.broadcast %cst_64 : f32 to vector<16x512xf32>
    %102 = arith.maximumf %100, %101 : vector<16x512xf32>
    %c510_i32_65 = arith.constant 510 : i32
    %103 = tpu.dynamic_rotate %102 by %c510_i32_65 dim 1 : vector<16x512xf32>, i32 -> vector<16x512xf32>
    %104 = arith.maximumf %102, %103 : vector<16x512xf32>
    %c480_i32_66 = arith.constant 480 : i32
    %105 = tpu.dynamic_rotate %104 by %c480_i32_66 dim 1 : vector<16x512xf32>, i32 -> vector<16x512xf32>
    %106 = arith.maximumf %104, %105 : vector<16x512xf32>
    %c0_67 = arith.constant 0 : index
    %c0_68 = arith.constant 0 : index
    %107 = vector.load %arg5[%c0_67, %c0_68] : memref<512x2xf32, #tpu.memory_space<vmem>>, vector<512x2xf32>
    %cst_69 = arith.constant dense<0.000000e+00> : vector<16x2xf32>
    %108 = tpu.matmul %106, %107, %cst_69 {dimension_numbers = #tpu.dot_dimension_numbers<[1], [0], [0], [1], [0, 0, 1, 1], [], []>} : vector<16x512xf32>, vector<512x2xf32>, vector<16x2xf32> -> vector<16x2xf32>
    %c24_70 = arith.constant 24 : index
    %c0_71 = arith.constant 0 : index
    %109 = vector.load %arg2[%c24_70, %c0_71] : memref<64x128xf32, #tpu.memory_space<vmem>>, vector<32x16xf32>
    %cst_72 = arith.constant dense<0.000000e+00> : vector<32x2xf32>
    %110 = tpu.matmul %109, %108, %cst_72 {dimension_numbers = #tpu.dot_dimension_numbers<[1], [0], [0], [1], [0, 0, 1, 1], [], []>} : vector<32x16xf32>, vector<16x2xf32>, vector<32x2xf32> -> vector<32x2xf32>
    %c24_73 = arith.constant 24 : index
    %c0_74 = arith.constant 0 : index
    %111 = vector.load %arg3[%c24_73, %c0_74] : memref<64x1xf32, #tpu.memory_space<vmem>>, vector<32x1xf32>
    %112 = vector.broadcast %111 : vector<32x1xf32> to vector<32x2xf32>
    %113 = arith.addf %110, %112 : vector<32x2xf32>
    %cst_75 = arith.constant 0.000000e+00 : f32
    %114 = vector.broadcast %cst_75 : f32 to vector<32x2xf32>
    %115 = arith.maximumf %113, %114 : vector<32x2xf32>
    %c56_76 = arith.constant 56 : index
    %c0_77 = arith.constant 0 : index
    %116 = vector.load %arg2[%c56_76, %c0_77] : memref<64x128xf32, #tpu.memory_space<vmem>>, vector<8x32xf32>
    %cst_78 = arith.constant dense<0.000000e+00> : vector<8x2xf32>
    %117 = tpu.matmul %116, %115, %cst_78 {dimension_numbers = #tpu.dot_dimension_numbers<[1], [0], [0], [1], [0, 0, 1, 1], [], []>} : vector<8x32xf32>, vector<32x2xf32>, vector<8x2xf32> -> vector<8x2xf32>
    %c56_79 = arith.constant 56 : index
    %c0_80 = arith.constant 0 : index
    %118 = vector.load %arg3[%c56_79, %c0_80] : memref<64x1xf32, #tpu.memory_space<vmem>>, vector<8x1xf32>
    %119 = vector.broadcast %118 : vector<8x1xf32> to vector<8x2xf32>
    %120 = arith.addf %117, %119 : vector<8x2xf32>
    %121 = vector.extract_strided_slice %120 {offsets = [0, 0], sizes = [2, 2], strides = [1, 1]} : vector<8x2xf32> to vector<2x2xf32>
    %122 = math.tanh %121 : vector<2x2xf32>
    %cst_81 = arith.constant 6.000000e-01 : f32
    %123 = vector.broadcast %cst_81 : f32 to vector<2x2xf32>
    %124 = arith.mulf %122, %123 : vector<2x2xf32>
    %cst_82 = arith.constant 6.000000e-01 : f32
    %125 = vector.broadcast %cst_82 : f32 to vector<2x2xf32>
    %126 = arith.addf %124, %125 : vector<2x2xf32>
    %c0_83 = arith.constant 0 : index
    %c0_84 = arith.constant 0 : index
    %c0_85 = arith.constant 0 : index
    %127 = vector.load %arg6[%c0_83, %c0_84, %c0_85] : memref<1x2x2xf32, #tpu.memory_space<vmem>>, vector<1x2x2xf32>
    %128 = vector.shape_cast %127 : vector<1x2x2xf32> to vector<2x2xf32>
    %129 = vector.shape_cast %126 : vector<2x2xf32> to vector<1x2x2xf32>
    tpu.vector_store %arg6[%c0_83, %c0_84, %c0_85], %129 {strides = array<i32>} : memref<1x2x2xf32, #tpu.memory_space<vmem>>, vector<1x2x2xf32>,
    return
  }
  func.func @transform_0(%arg0: i32) -> (i32, i32) {
    %c0_i32 = arith.constant 0 : i32
    %c0_i32_0 = arith.constant 0 : i32
    return %c0_i32, %arg0 : i32, i32
  }
  func.func @transform_1(%arg0: i32) -> (i32, i32) {
    %c0_i32 = arith.constant 0 : i32
    %c0_i32_0 = arith.constant 0 : i32
    %c0_i32_1 = arith.constant 0 : i32
    return %c0_i32, %c0_i32_0 : i32, i32
  }
  func.func @transform_2(%arg0: i32) -> (i32, i32) {
    %c0_i32 = arith.constant 0 : i32
    %c0_i32_0 = arith.constant 0 : i32
    %c0_i32_1 = arith.constant 0 : i32
    return %c0_i32, %c0_i32_0 : i32, i32
  }
  func.func @transform_3(%arg0: i32) -> (i32, i32) {
    %c0_i32 = arith.constant 0 : i32
    %c0_i32_0 = arith.constant 0 : i32
    %c0_i32_1 = arith.constant 0 : i32
    return %c0_i32, %c0_i32_0 : i32, i32
  }
  func.func @transform_4(%arg0: i32) -> (i32, i32) {
    %c0_i32 = arith.constant 0 : i32
    %c0_i32_0 = arith.constant 0 : i32
    %c0_i32_1 = arith.constant 0 : i32
    return %c0_i32, %c0_i32_0 : i32, i32
  }
  func.func @transform_5(%arg0: i32) -> (i32, i32, i32) {
    %c0_i32 = arith.constant 0 : i32
    %c0_i32_0 = arith.constant 0 : i32
    %c0_i32_1 = arith.constant 0 : i32
    return %arg0, %c0_i32, %c0_i32_0 : i32, i32, i32
  }
}

</mosaic_0001>

<bundles_post_ra>
// kernel: tpu_custom_call.1
= control target key start
LH: loop header
LB: loop body
LE: loop exit
PB: predicated region body
PF: predicated region fallthrough
CT: control target
= control target key end

     0   :  { %s2050_s22 = smov 17   ;;  %s2856_s0 = inlined_call_operand.vmem [shape: f32[8,512], index: 0, kind: input, shape index: {}]   ;;  %s2857_s1 = inlined_call_operand.vmem [shape: f32[64,128], index: 1, kind: input, shape index: {}]   ;;  %s2858_s2 = inlined_call_operand.vmem [shape: f32[64,1], index: 2, kind: input, shape index: {}]   ;;  %s2859_s3 = inlined_call_operand.vmem [shape: f32[18,512], index: 3, kind: input, shape index: {}]   ;;  %s2860_s4 = inlined_call_operand.vmem [shape: f32[512,2], index: 4, kind: input, shape index: {}]   ;;  %s2861_s5 = inlined_call_operand.hbm [shape: f32[1,2,2], index: 5, kind: output, shape index: {}]  }
   0x1   :  { %v2104_v0 = vld [vmem:[%s2856_s0 + $0x10] sm:$0xff]  ;;  %v2109_v1 = vld [vmem:[%s2856_s0] sm:$0xff]  ;;  %v2116_v2 = vld [vmem:[%s2856_s0 + $0x18] sm:$0xff] }
   0x2   :  { %29 = vrot.lane.b32.xlu1 %v2104_v0, %s2050_s22  ;;  %25 = vrot.lane.b32.xlu0 %v2109_v1, %s2050_s22  ;;  %v2121_v3 = vld [vmem:[%s2856_s0 + $0x8] sm:$0xff] }
   0x3   :  { %10 = vsyncpa [#allocation4], 0  ;;  %s2051_s27 = smov 16   ;;  %s2052_s28 = smov 15   ;;  %v2057_v4 = vmov 0.0   ;;  %v2058_v5 = vmov 0   ;;  %v33_v7 = vlaneseq }
   0x4   :  { %s2053_s0 = smov 1   ;;  %s2054_s29 = smov 127   ;;  %493 = vmatprep.mubr.f32.mxu0 %v2057_v4  ;;  %564 = vmatprep.mubr.f32.mxu1 %v2057_v4  ;;  %v419_v6 = vld [vmem:[%s2858_s2] sm:$0xff]  ;;  %vm425_vm8 = vcmask 588800  }
   0x5   :  { %s2055_s30 = smov 113   ;;  %s2056_s6 = smov 112   ;;  %1982 = vset.pattern.permute.xlu0 %v2058_v5  ;;  %1983 = vset.pattern.permute.xlu1 %v2058_v5  ;;  %v43_v8 = vshrl.u32 %v33_v7, 7  ;;  %v2166_v11 = vand.u32 127, %v33_v7 }
   0x6   :  { %31 = vrot.lane.b32.xlu1 %v2116_v2, %s2050_s22  ;;  %27 = vrot.lane.b32.xlu0 %v2121_v3, %s2050_s22  ;;  %s2059_s7 = smov 111   ;;  %v40_v13 = vld [vmem:[%s2859_s3] ss:$8 sm:$0xf]  ;;  %s2066_s8 = smov 96  }
   0x7   :  { %v2168_v12 = vsub.s32 1, %v43_v8  ;;  %v1689_v14 = vld [vmem:[%s2859_s3 + $0x1] ss:$8 sm:$0xf]  ;;  %vm35_vm0 = vcmp.lt.s32.totalorder %v2166_v11, 17  ;;  %v2177_v15 = vsub.s32 0, %v43_v8 }
   0x8   :  { %v2179_v17 = vsub.s32 2, %v43_v8  ;;  %v2181_v19 = vsub.s32 3, %v43_v8  ;;  %vm78_vm1 = vcmp.lt.s32.totalorder %v2166_v11, 16  ;;  %v1690_v54 = vld [vmem:[%s2859_s3 + $0x2] ss:$8 sm:$0xf] }
   0x9   :  { %v49_v20 = vrot.slane %v40_v13, %v2168_v12  ;;  %v93_v21 = vrot.slane %v1689_v14, %v2168_v12  ;;  %v45_v23 = vrot.slane %v40_v13, %v2177_v15  ;;  %v89_v27 = vrot.slane %v1689_v14, %v2177_v15  ;;  %v1691_v55 = vld [vmem:[%s2859_s3 + $0x3] ss:$8 sm:$0xf]  ;;  %s2067_s9 = smov 94   ;;  %s2070_s23 = smov [#allocation3]  }
   0xa   :  { %72 = vrot.lane.b32.xlu1 %v2121_v3, %s2051_s27  ;;  %70 = vrot.lane.b32.xlu0 %v2109_v1, %s2051_s27  ;;  %v53_v24 = vrot.slane %v40_v13, %v2179_v17  ;;  %v97_v30 = vrot.slane %v1689_v14, %v2179_v17  ;;  %v57_v31 = vrot.slane %v40_v13, %v2181_v19  ;;  %vm122_vm2 = vcmp.lt.s32.totalorder %v2166_v11, 15  ;;  %s1681_s24 = sshll.u32 %s2070_s23, 4  ;;  %s1682_s24 = int_to_ptr.vmem [resolvable:$true] %s1681_s24 }
   0xb   :  { %v101_v35 = vrot.slane %v1689_v14, %v2181_v19  ;;  %v137_v58 = vrot.slane %v1690_v54, %v2168_v12  ;;  %vm166_vm3 = vcmp.lt.s32.totalorder %v2166_v11, 1  ;;  %v181_v59 = vrot.slane %v1691_v55, %v2168_v12  ;;  %s2026_s25 = scalar_lea.vmem %s1682_s24, 32  ;;  %p2031_p1 = scmp.lt.s32.totalorder %s1682_s24, %s1682_s24 }
   0xc   :  { %v133_v61 = vrot.slane %v1690_v54, %v2177_v15  ;;  %v141_v62 = vrot.slane %v1690_v54, %v2179_v17  ;;  %v145_v63 = vrot.slane %v1690_v54, %v2181_v19  ;;  %vm214_vm4 = vcmp.lt.s32.totalorder %v2166_v11, 127  ;;  %p2027_p0 = scmp.ne.s32.totalorder %s1682_s24, %s2026_s25  ;;  %p2032_p2 = scmp.lt.s32.totalorder %s2026_s25, %s2026_s25 }
   0xd   :  { %vm302_vm5 = vcmp.lt.s32.totalorder %v2166_v11, 112  ;;  %vm258_vm6 = vcmp.lt.s32.totalorder %v2166_v11, 113  ;;  %vm346_vm7 = vcmp.lt.s32.totalorder %v2166_v11, 111  ;;  %vm615_vm9 = vcmp.lt.s32.totalorder %v2166_v11, 34 }
   0xe   :  { %76 = vrot.lane.b32.xlu1 %v2116_v2, %s2051_s27  ;;  %74 = vrot.lane.b32.xlu0 %v2104_v0, %s2051_s27  ;;  %vm659_vm10 = vcmp.lt.s32.totalorder %v2166_v11, 32  ;;  %vm703_vm11 = vcmp.lt.s32.totalorder %v2166_v11, 30  ;;  %vm747_vm12 = vcmp.lt.s32.totalorder %v2166_v11, 2  ;;  %vm795_vm13 = vcmp.lt.s32.totalorder %v2166_v11, 126  ;;  %p2033_p3 = por %p2032_p2, %p2031_p1 }
   0xf   :  { %vm839_vm14 = vcmp.lt.s32.totalorder %v2166_v11, 98  ;;  %vm883_vm15 = vcmp.lt.s32.totalorder %v2166_v11, 96 }
  0x10   :  { %p2034_p4 = pnand %p2033_p3, %p2027_p0 }
  0x12   :  { %116 = vrot.lane.b32.xlu1 %v2121_v3, %s2052_s28  ;;  %114 = vrot.lane.b32.xlu0 %v2109_v1, %s2052_s28 }
  0x16   :  { %120 = vrot.lane.b32.xlu1 %v2116_v2, %s2052_s28  ;;  %118 = vrot.lane.b32.xlu0 %v2104_v0, %s2052_s28  ;;  %s2060_s28 = smov 34  }
  0x1a   :  { %160 = vrot.lane.b32.xlu1 %v2121_v3, %s2053_s0  ;;  %158 = vrot.lane.b32.xlu0 %v2109_v1, %s2053_s0 }
  0x1e   :  { %164 = vrot.lane.b32.xlu1 %v2116_v2, %s2053_s0  ;;  %162 = vrot.lane.b32.xlu0 %v2104_v0, %s2053_s0  ;;  %s2061_s0 = smov 32  }
  0x22   :  { %208 = vrot.lane.b32.xlu1 %v2121_v3, %s2054_s29  ;;  %206 = vrot.lane.b32.xlu0 %v2109_v1, %s2054_s29 }
  0x26   :  { %212 = vrot.lane.b32.xlu1 %v2116_v2, %s2054_s29  ;;  %210 = vrot.lane.b32.xlu0 %v2104_v0, %s2054_s29 }
  0x2a   :  { %252 = vrot.lane.b32.xlu1 %v2121_v3, %s2055_s30  ;;  %250 = vrot.lane.b32.xlu0 %v2109_v1, %s2055_s30 }
  0x2e   :  { %256 = vrot.lane.b32.xlu1 %v2116_v2, %s2055_s30  ;;  %254 = vrot.lane.b32.xlu0 %v2104_v0, %s2055_s30  ;;  %s2063_s30 = smov 2  }
  0x32   :  { %296 = vrot.lane.b32.xlu1 %v2121_v3, %s2056_s6  ;;  %294 = vrot.lane.b32.xlu0 %v2109_v1, %s2056_s6 }
  0x36   :  { %300 = vrot.lane.b32.xlu1 %v2116_v2, %s2056_s6  ;;  %298 = vrot.lane.b32.xlu0 %v2104_v0, %s2056_s6 }
  0x3a   :  { %340 = vrot.lane.b32.xlu1 %v2121_v3, %s2059_s7  ;;  %338 = vrot.lane.b32.xlu0 %v2109_v1, %s2059_s7 }
  0x3e   :  { %344 = vrot.lane.b32.xlu1 %v2116_v2, %s2059_s7  ;;  %342 = vrot.lane.b32.xlu0 %v2104_v0, %s2059_s7  ;;  %s2065_s7 = smov 98  }
  0x42   :  { %422 = vperm.xlu0 %1982, %v419_v6  }
  0x74   :  { %v30_v9 = vpop.permute.xlu1 %29  ;;  %v26_v10 = vpop.permute.xlu0 %25 }
  0x78   :  { %v32_v16 = vpop.permute.xlu1 %31  ;;  %v28_v18 = vpop.permute.xlu0 %27 }
  0x79   :  { %v38_v22 = vsel %vm35_vm0, %v26_v10, %v28_v18  ;;  %v39_v28 = vsel %vm35_vm0, %v32_v16, %v26_v10  ;;  %v37_v32 = vsel %vm35_vm0, %v28_v18, %v30_v9  ;;  %v36_v36 = vsel %vm35_vm0, %v30_v9, %v32_v16 }
  0x7a   :  { %v63_v33 = vmul.f32 %v49_v20, %v38_v22  ;;  %v62_v37 = vmul.f32 %v45_v23, %v39_v28  ;;  %v64_v41 = vmul.f32 %v53_v24, %v37_v32  ;;  %v65_v47 = vmul.f32 %v57_v31, %v36_v36 }
  0x7b   :  { %v177_v9 = vrot.slane %v1691_v55, %v2177_v15  ;;  %v185_v10 = vrot.slane %v1691_v55, %v2179_v17  ;;  %v189_v18 = vrot.slane %v1691_v55, %v2181_v19  ;;  %vm927_vm0 = vcmp.lt.s32.totalorder %v2166_v11, 94 }
  0x7c   :  { %v73_v25 = vpop.permute.xlu1 %72  ;;  %v71_v26 = vpop.permute.xlu0 %70 }
  0x7d   :  { %v81_v29 = vsel %vm78_vm1, %v71_v26, %v73_v25 }
  0x7e   :  { %v107_v34 = vmul.f32 %v93_v21, %v81_v29 }
  0x80   :  { %v77_v38 = vpop.permute.xlu1 %76  ;;  %v75_v39 = vpop.permute.xlu0 %74  ;;  %v1823_v40 = vpack.c.bf16 %v107_v34, %v63_v33  ;;  %v1692_v33 = vld [vmem:[%s2859_s3 + $0x5] ss:$8 sm:$0xf] }
  0x81   :  { %v82_v42 = vsel %vm78_vm1, %v77_v38, %v71_v26  ;;  %v79_v43 = vsel %vm78_vm1, %v75_v39, %v77_v38  ;;  %v80_v44 = vsel %vm78_vm1, %v73_v25, %v75_v39  ;;  %v225_v39 = vrot.slane %v1692_v33, %v2177_v15 }
  0x82   :  { %v106_v45 = vmul.f32 %v89_v27, %v82_v42  ;;  %v108_v46 = vmul.f32 %v97_v30, %v80_v44  ;;  %1824 = vmatprep.subr.bf16.mxu0 %v1823_v40  ;;  %v109_v48 = vmul.f32 %v101_v35, %v79_v43  ;;  %v237_v40 = vrot.slane %v1692_v33, %v2181_v19 }
  0x83   :  { %v229_v42 = vrot.slane %v1692_v33, %v2168_v12  ;;  %v233_v43 = vrot.slane %v1692_v33, %v2179_v17  ;;  %vm1487_vm1 = vcmask 130048  }
  0x84   :  { %v117_v49 = vpop.permute.xlu1 %116  ;;  %v115_v50 = vpop.permute.xlu0 %114  ;;  %v1825_v51 = vpack.c.bf16 %v106_v45, %v62_v37  ;;  %v1839_v52 = vpack.c.bf16 %v109_v48, %v65_v47  ;;  %v1841_v53 = vpack.c.bf16 %v108_v46, %v64_v41 }
  0x85   :  { %v125_v60 = vsel %vm122_vm2, %v115_v50, %v117_v49 }
  0x86   :  { %1826 = vmatpush1.bf16.msra.mxu0 %v1825_v51  ;;  %1840 = vmatprep.subr.bf16.mxu1 %v1839_v52  ;;  %v151_v13 = vmul.f32 %v137_v58, %v125_v60 }
  0x87   :  { %1842 = vmatpush1.bf16.msra.mxu1 %v1841_v53 }
  0x88   :  { %v121_v56 = vpop.permute.xlu1 %120  ;;  %v119_v57 = vpop.permute.xlu0 %118 }
  0x89   :  { %v126_v7 = vsel %vm122_vm2, %v121_v56, %v115_v50  ;;  %v124_v14 = vsel %vm122_vm2, %v117_v49, %v119_v57  ;;  %v123_v20 = vsel %vm122_vm2, %v119_v57, %v121_v56  ;;  %vm2069_vm2 = vmmov 0  }
  0x8a   :  { %v150_v21 = vmul.f32 %v133_v61, %v126_v7  ;;  %v152_v25 = vmul.f32 %v141_v62, %v124_v14  ;;  %v153_v29 = vmul.f32 %v145_v63, %v123_v20  ;;  %v1694_v61 = vld [vmem:[%s2859_s3 + $0x7] ss:$8 sm:$0xf] }
  0x8b   :  { %v313_v7 = vrot.slane %v1694_v61, %v2177_v15 }
  0x8c   :  { %v161_v5 = vpop.permute.xlu1 %160  ;;  %v159_v6 = vpop.permute.xlu0 %158 }
  0x8d   :  { %v169_v8 = vsel %vm166_vm3, %v159_v6, %v161_v5 }
  0x8e   :  { %v195_v16 = vmul.f32 %v181_v59, %v169_v8 }
  0x90   :  { %v165_v22 = vpop.permute.xlu1 %164  ;;  %v163_v23 = vpop.permute.xlu0 %162  ;;  %v1827_v24 = vpack.c.bf16 %v195_v16, %v151_v13  ;;  %v321_v13 = vrot.slane %v1694_v61, %v2179_v17 }
  0x91   :  { %v170_v26 = vsel %vm166_vm3, %v165_v22, %v159_v6  ;;  %v167_v27 = vsel %vm166_vm3, %v163_v23, %v165_v22  ;;  %v168_v28 = vsel %vm166_vm3, %v161_v5, %v163_v23  ;;  %vm1596_vm3 = vcmask 261120  }
  0x92   :  { %v194_v30 = vmul.f32 %v177_v9, %v170_v26  ;;  %v196_v31 = vmul.f32 %v185_v10, %v168_v28  ;;  %v197_v32 = vmul.f32 %v189_v18, %v167_v27  ;;  %1828 = vmatprep.subr.bf16.mxu0 %v1827_v24  ;;  %v325_v9 = vrot.slane %v1694_v61, %v2181_v19 }
  0x93   :  { %v317_v10 = vrot.slane %v1694_v61, %v2168_v12 }
  0x94   :  { %v209_v34 = vpop.permute.xlu1 %208  ;;  %v207_v35 = vpop.permute.xlu0 %206  ;;  %v1829_v36 = vpack.c.bf16 %v194_v30, %v150_v21  ;;  %v1843_v37 = vpack.c.bf16 %v197_v32, %v153_v29  ;;  %v1845_v38 = vpack.c.bf16 %v196_v31, %v152_v25 }
  0x95   :  { %v217_v41 = vsel %vm214_vm4, %v207_v35, %v209_v34 }
  0x96   :  { %1830 = vmatpush1.bf16.msra.mxu0 %v1829_v36  ;;  %1844 = vmatprep.subr.bf16.mxu1 %v1843_v37  ;;  %v242_v46 = vmul.f32 %v225_v39, %v217_v41 }
  0x97   :  { %1846 = vmatpush1.bf16.msra.mxu1 %v1845_v38 }
  0x98   :  { %v213_v44 = vpop.permute.xlu1 %212  ;;  %v211_v45 = vpop.permute.xlu0 %210  ;;  %v1833_v58 = vpack.c.bf16 %v242_v46, %v2109_v1 }
  0x99   :  { %v218_v47 = vsel %vm214_vm4, %v213_v44, %v207_v35  ;;  %v215_v48 = vsel %vm214_vm4, %v211_v45, %v213_v44  ;;  %v216_v49 = vsel %vm214_vm4, %v209_v34, %v211_v45  ;;  %v1695_v34 = vld [vmem:[%s2859_s3 + $0x20] ss:$8 sm:$0xf] }
  0x9a   :  { %v245_v50 = vmul.f32 %v237_v40, %v218_v47  ;;  %v243_v51 = vmul.f32 %v229_v42, %v216_v49  ;;  %v244_v52 = vmul.f32 %v233_v43, %v215_v48  ;;  %v369_v40 = vrot.slane %v1695_v34, %v2181_v19 }
  0x9b   :  { %v361_v41 = vrot.slane %v1695_v34, %v2168_v12  ;;  %v365_v42 = vrot.slane %v1695_v34, %v2179_v17  ;;  %v357_v43 = vrot.slane %v1695_v34, %v2177_v15  ;;  %v1001_v34 = vld [vmem:[%s2858_s2 + $0x8] sm:$0xff] }
  0x9c   :  { %v253_v53 = vpop.permute.xlu1 %252  ;;  %v251_v54 = vpop.permute.xlu0 %250  ;;  %v1831_v55 = vpack.c.bf16 %v243_v51, %v2121_v3  ;;  %v1847_v56 = vpack.c.bf16 %v245_v50, %v2116_v2  ;;  %v1849_v57 = vpack.c.bf16 %v244_v52, %v2104_v0  ;;  %v1693_v3 = vld [vmem:[%s2859_s3 + $0x6] ss:$8 sm:$0xf] }
  0x9d   :  { %v281_v0 = vrot.slane %v1693_v3, %v2181_v19  ;;  %v273_v1 = vrot.slane %v1693_v3, %v2168_v12  ;;  %v277_v5 = vrot.slane %v1693_v3, %v2179_v17  ;;  %v269_v14 = vrot.slane %v1693_v3, %v2177_v15 }
  0x9e   :  { %1832 = vmatprep.subr.bf16.mxu0 %v1831_v55  ;;  %1848 = vmatprep.subr.bf16.mxu1 %v1847_v56  ;;  %v261_v18 = vsel %vm258_vm6, %v251_v54, %v253_v53 }
  0x9f   :  { %1834 = vmatpush1.bf16.msra.mxu0 %v1833_v58  ;;  %1850 = vmatpush1.bf16.msra.mxu1 %v1849_v57  ;;  %v286_v32 = vmul.f32 %v269_v14, %v261_v18 }
  0xa0   :  { %v257_v59 = vpop.permute.xlu1 %256  ;;  %v255_v60 = vpop.permute.xlu0 %254 }
  0xa1   :  { %v262_v63 = vsel %vm258_vm6, %v257_v59, %v251_v54  ;;  %v260_v6 = vsel %vm258_vm6, %v253_v53, %v255_v60  ;;  %v259_v16 = vsel %vm258_vm6, %v255_v60, %v257_v59  ;;  %v382_v54 = vld [vmem:[%s2857_s1] sm:$0xff] }
  0xa2   :  { %v289_v20 = vmul.f32 %v281_v0, %v262_v63  ;;  %v287_v21 = vmul.f32 %v273_v1, %v260_v6  ;;  %v288_v28 = vmul.f32 %v277_v5, %v259_v16 }
  0xa4   :  { %v297_v2 = vpop.permute.xlu1 %296  ;;  %v295_v62 = vpop.permute.xlu0 %294 }
  0xa5   :  { %v305_v8 = vsel %vm302_vm5, %v295_v62, %v297_v2 }
  0xa6   :  { %v330_v24 = vmul.f32 %v313_v7, %v305_v8 }
  0xa8   :  { %v301_v22 = vpop.permute.xlu1 %300  ;;  %v299_v23 = vpop.permute.xlu0 %298  ;;  %v1837_v39 = vpack.c.bf16 %v330_v24, %v286_v32 }
  0xa9   :  { %v306_v25 = vsel %vm302_vm5, %v301_v22, %v295_v62  ;;  %v303_v26 = vsel %vm302_vm5, %v299_v23, %v301_v22  ;;  %v304_v27 = vsel %vm302_vm5, %v297_v2, %v299_v23 }
  0xaa   :  { %v333_v29 = vmul.f32 %v325_v9, %v306_v25  ;;  %v331_v30 = vmul.f32 %v317_v10, %v304_v27  ;;  %v332_v31 = vmul.f32 %v321_v13, %v303_v26 }
  0xac   :  { %v341_v33 = vpop.permute.xlu1 %340  ;;  %v339_v35 = vpop.permute.xlu0 %338  ;;  %v1835_v36 = vpack.c.bf16 %v331_v30, %v287_v21  ;;  %v1851_v37 = vpack.c.bf16 %v333_v29, %v289_v20  ;;  %v1853_v38 = vpack.c.bf16 %v332_v31, %v288_v28 }
  0xad   :  { %v349_v44 = vsel %vm346_vm7, %v339_v35, %v341_v33 }
  0xae   :  { %1836 = vmatprep.subr.bf16.mxu0 %v1835_v36  ;;  %1852 = vmatprep.subr.bf16.mxu1 %v1851_v37  ;;  %v374_v53 = vmul.f32 %v357_v43, %v349_v44 }
  0xaf   :  { %1838 = vmatpush1.bf16.msra.mxu0 %v1837_v39  ;;  %1854 = vmatpush1.bf16.msra.mxu1 %v1853_v38  ;;  %v1698_v39 = vld [vmem:[%s2859_s3 + $0x21] ss:$8 sm:$0xf] }
  0xb0   :  { %v345_v45 = vpop.permute.xlu1 %344  ;;  %v343_v46 = vpop.permute.xlu0 %342  ;;  %v630_v43 = vrot.slane %v1698_v39, %v2168_v12 }
  0xb1   :  { %v350_v47 = vsel %vm346_vm7, %v345_v45, %v339_v35  ;;  %v347_v48 = vsel %vm346_vm7, %v343_v46, %v345_v45  ;;  %v348_v49 = vsel %vm346_vm7, %v341_v33, %v343_v46  ;;  %v1002_v35 = vld [vmem:[%s2858_s2 + $0x10] sm:$0xff]  ;;  %v626_v46 = vrot.slane %v1698_v39, %v2177_v15 }
  0xb2   :  { %v377_v50 = vmul.f32 %v369_v40, %v350_v47  ;;  %v375_v51 = vmul.f32 %v361_v41, %v348_v49  ;;  %v376_v52 = vmul.f32 %v365_v42, %v347_v48  ;;  %v1699_v40 = vld [vmem:[%s2859_s3 + $0x22] ss:$8 sm:$0xf]  ;;  %v638_v49 = vrot.slane %v1698_v39, %v2181_v19 }
  0xb3   :  { %v674_v44 = vrot.slane %v1699_v40, %v2168_v12 }
  0xb4   :  { %445 = vmatprep.subr.mxu0 %v375_v51  ;;  %516 = vmatprep.subr.mxu1 %v377_v50  ;;  %v678_v50 = vrot.slane %v1699_v40, %v2179_v17 }
  0xb5   :  { %446 = vmatpush1.msra.mxu0 %v374_v53  ;;  %517 = vmatpush1.msra.mxu1 %v376_v52  ;;  %v670_v52 = vrot.slane %v1699_v40, %v2177_v15 }
  0xb6   :  { %1696 = vmatmul.mubr.msk.f32.vlgmr.msra.gmra.mrb[0].mxu0 %vm425_vm8, %v382_v54  ;;  %1697 = vmatmul.mubr.msk.f32.vlgmr.msra.gmra.mrb[0].mxu1 %vm425_vm8, %v382_v54 }
  0xb7   :  { %1083 = vmatprep.mubr.f32.mxu0 %v2057_v4  ;;  %1160 = vmatprep.mubr.f32.mxu1 %v2057_v4 }
  0xc1   :  { %v423_v55 = vpop.permute.xlu0 %422 }
 0x189   :  { %v495_v56 = vpop.f32.mrb[0].mxu0  ;;  %v566_v57 = vpop.f32.mrb[0].mxu1 }
 0x18a   :  { %v497_v58 = vpop.f32.mrb[1].mxu0  ;;  %v568_v59 = vpop.f32.mrb[1].mxu1  ;;  %v567_v60 = vadd.f32 %v566_v57, %v423_v55  ;;  %v496_v61 = vadd.f32 %v495_v56, %v423_v55  ;;  %v682_v56 = vrot.slane %v1699_v40, %v2181_v19  ;;  %v634_v57 = vrot.slane %v1698_v39, %v2179_v17 }
 0x18b   :  { %v498_v3 = vadd.f32 %v497_v58, %v423_v55  ;;  %v569_v62 = vadd.f32 %v568_v59, %v423_v55 }
 0x18c   :  { %v573_v0 = vmax.f32 %v567_v60, 0.0  ;;  %v571_v1 = vmax.f32 %v496_v61, 0.0 }
 0x18d   :  { %v572_v2 = vmax.f32 %v498_v3, 0.0  ;;  %v574_v63 = vmax.f32 %v569_v62, 0.0 }
 0x18e   :  { %579 = vrot.lane.b32.xlu0 %v573_v0, %s2054_s29  ;;  %575 = vrot.lane.b32.xlu1 %v571_v1, %s2054_s29 }
 0x192   :  { %577 = vrot.lane.b32.xlu1 %v572_v2, %s2054_s29 }
 0x196   :  { %581 = vrot.lane.b32.xlu1 %v574_v63, %s2054_s29  ;;  %s2062_s29 = smov 30  }
 0x200   :  { %v576_v5 = vpop.permute.xlu1 %575  ;;  %v580_v6 = vpop.permute.xlu0 %579 }
 0x204   :  { %v578_v7 = vpop.permute.xlu1 %577 }
 0x205   :  { %v584_v8 = vsel %vm214_vm4, %v578_v7, %v580_v6  ;;  %v585_v9 = vsel %vm214_vm4, %v576_v5, %v578_v7 }
 0x206   :  { %v587_v10 = vmax.f32 %v571_v1, %v585_v9  ;;  %v588_v13 = vmax.f32 %v572_v2, %v584_v8 }
 0x208   :  { %591 = vrot.lane.b32.xlu0 %v587_v10, %s2056_s6  ;;  %593 = vrot.lane.b32.xlu1 %v588_v13, %s2056_s6  ;;  %v582_v14 = vpop.permute.xlu1 %581 }
 0x209   :  { %v583_v16 = vsel %vm214_vm4, %v580_v6, %v582_v14  ;;  %v586_v18 = vsel %vm214_vm4, %v582_v14, %v576_v5  ;;  %vm1673_vm4 = vcmask 9216  }
 0x20a   :  { %v589_v20 = vmax.f32 %v573_v0, %v583_v16  ;;  %v590_v21 = vmax.f32 %v574_v63, %v586_v18  ;;  %v1700_v18 = vld [vmem:[%s2859_s3 + $0x23] ss:$8 sm:$0xf] }
 0x20c   :  { %597 = vrot.lane.b32.xlu1 %v590_v21, %s2056_s6  ;;  %595 = vrot.lane.b32.xlu0 %v589_v20, %s2056_s6  ;;  %s2064_s6 = smov 126  }
 0x27a   :  { %v592_v22 = vpop.permute.xlu0 %591  ;;  %v594_v23 = vpop.permute.xlu1 %593 }
 0x27b   :  { %v601_v24 = vsel %vm302_vm5, %v592_v22, %v594_v23 }
 0x27c   :  { %v2317_v25 = vmax.f32 %v587_v10, %v601_v24 }
 0x27e   :  { %v596_v26 = vpop.permute.xlu0 %595  ;;  %607 = vrot.lane.b32.xlu0 %v2317_v25, %s2060_s28  ;;  %v598_v27 = vpop.permute.xlu1 %597 }
 0x27f   :  { %v600_v28 = vsel %vm302_vm5, %v594_v23, %v596_v26  ;;  %v599_v29 = vsel %vm302_vm5, %v596_v26, %v598_v27  ;;  %v602_v32 = vsel %vm302_vm5, %v598_v27, %v592_v22  ;;  %v718_v23 = vrot.slane %v1700_v18, %v2168_v12 }
 0x280   :  { %v2324_v30 = vmax.f32 %v588_v13, %v600_v28  ;;  %v2326_v31 = vmax.f32 %v589_v20, %v599_v29  ;;  %v2332_v33 = vmax.f32 %v590_v21, %v602_v32  ;;  %v1701_v20 = vld [vmem:[%s2859_s3 + $0x24] ss:$8 sm:$0xf]  ;;  %v714_v27 = vrot.slane %v1700_v18, %v2177_v15 }
 0x281   :  { %v762_v24 = vrot.slane %v1701_v20, %v2168_v12  ;;  %v726_v32 = vrot.slane %v1700_v18, %v2181_v19 }
 0x282   :  { %609 = vrot.lane.b32.xlu1 %v2324_v30, %s2060_s28  ;;  %611 = vrot.lane.b32.xlu0 %v2326_v31, %s2060_s28 }
 0x286   :  { %613 = vrot.lane.b32.xlu1 %v2332_v33, %s2060_s28  ;;  %651 = vrot.lane.b32.xlu0 %v2317_v25, %s2061_s0 }
 0x28a   :  { %653 = vrot.lane.b32.xlu1 %v2324_v30, %s2061_s0  ;;  %655 = vrot.lane.b32.xlu0 %v2326_v31, %s2061_s0 }
 0x28e   :  { %657 = vrot.lane.b32.xlu1 %v2332_v33, %s2061_s0  ;;  %695 = vrot.lane.b32.xlu0 %v2317_v25, %s2062_s29 }
 0x292   :  { %697 = vrot.lane.b32.xlu1 %v2324_v30, %s2062_s29  ;;  %699 = vrot.lane.b32.xlu0 %v2326_v31, %s2062_s29 }
 0x296   :  { %701 = vrot.lane.b32.xlu1 %v2332_v33, %s2062_s29  ;;  %739 = vrot.lane.b32.xlu0 %v2317_v25, %s2063_s30 }
 0x29a   :  { %741 = vrot.lane.b32.xlu1 %v2324_v30, %s2063_s30  ;;  %743 = vrot.lane.b32.xlu0 %v2326_v31, %s2063_s30 }
 0x29e   :  { %745 = vrot.lane.b32.xlu1 %v2332_v33, %s2063_s30  ;;  %787 = vrot.lane.b32.xlu0 %v2317_v25, %s2064_s6 }
 0x2a2   :  { %789 = vrot.lane.b32.xlu1 %v2324_v30, %s2064_s6  ;;  %791 = vrot.lane.b32.xlu0 %v2326_v31, %s2064_s6 }
 0x2a6   :  { %793 = vrot.lane.b32.xlu1 %v2332_v33, %s2064_s6  ;;  %831 = vrot.lane.b32.xlu0 %v2317_v25, %s2065_s7 }
 0x2aa   :  { %833 = vrot.lane.b32.xlu1 %v2324_v30, %s2065_s7  ;;  %835 = vrot.lane.b32.xlu0 %v2326_v31, %s2065_s7 }
 0x2ae   :  { %837 = vrot.lane.b32.xlu1 %v2332_v33, %s2065_s7  ;;  %875 = vrot.lane.b32.xlu0 %v2317_v25, %s2066_s8 }
 0x2b2   :  { %877 = vrot.lane.b32.xlu1 %v2324_v30, %s2066_s8  ;;  %879 = vrot.lane.b32.xlu0 %v2326_v31, %s2066_s8 }
 0x2b6   :  { %881 = vrot.lane.b32.xlu1 %v2332_v33, %s2066_s8  ;;  %919 = vrot.lane.b32.xlu0 %v2317_v25, %s2067_s9 }
 0x2ba   :  { %921 = vrot.lane.b32.xlu1 %v2324_v30, %s2067_s9  ;;  %923 = vrot.lane.b32.xlu0 %v2326_v31, %s2067_s9 }
 0x2be   :  { %925 = vrot.lane.b32.xlu1 %v2332_v33, %s2067_s9  ;;  %1005 = vperm.xlu0 %1982, %v1001_v34   ;;  %v766_v34 = vrot.slane %v1701_v20, %v2179_v17 }
 0x2c2   :  { %1010 = vperm.xlu1 %1983, %v1002_v35  }
 0x2f0   :  { %v608_v36 = vpop.permute.xlu0 %607 }
 0x2f4   :  { %v612_v37 = vpop.permute.xlu0 %611  ;;  %v610_v38 = vpop.permute.xlu1 %609 }
 0x2f5   :  { %v618_v45 = vsel %vm615_vm9, %v608_v36, %v610_v38  ;;  %v617_v60 = vsel %vm615_vm9, %v610_v38, %v612_v37 }
 0x2f6   :  { %v644_v53 = vmul.f32 %v630_v43, %v618_v45  ;;  %v645_v8 = vmul.f32 %v634_v57, %v617_v60 }
 0x2f8   :  { %v652_v41 = vpop.permute.xlu0 %651  ;;  %v614_v42 = vpop.permute.xlu1 %613 }
 0x2f9   :  { %v616_v58 = vsel %vm615_vm9, %v612_v37, %v614_v42  ;;  %v619_v59 = vsel %vm615_vm9, %v614_v42, %v608_v36  ;;  %v758_v36 = vrot.slane %v1701_v20, %v2177_v15  ;;  %v1702_v37 = vld [vmem:[%s2859_s3 + $0x26] ss:$8 sm:$0xf]  ;;  %v722_v42 = vrot.slane %v1700_v18, %v2179_v17 }
 0x2fa   :  { %v643_v63 = vmul.f32 %v626_v46, %v619_v59  ;;  %v646_v5 = vmul.f32 %v638_v49, %v616_v58  ;;  %v806_v49 = vrot.slane %v1702_v37, %v2177_v15 }
 0x2fc   :  { %v656_v47 = vpop.permute.xlu0 %655  ;;  %v654_v48 = vpop.permute.xlu1 %653 }
 0x2fd   :  { %v662_v51 = vsel %vm659_vm10, %v652_v41, %v654_v48  ;;  %v661_v54 = vsel %vm659_vm10, %v654_v48, %v656_v47 }
 0x2fe   :  { %v688_v55 = vmul.f32 %v674_v44, %v662_v51  ;;  %v689_v1 = vmul.f32 %v678_v50, %v661_v54 }
 0x300   :  { %v696_v61 = vpop.permute.xlu0 %695  ;;  %v658_v3 = vpop.permute.xlu1 %657  ;;  %v1855_v0 = vpack.c.bf16 %v688_v55, %v644_v53  ;;  %v1873_v16 = vpack.c.bf16 %v689_v1, %v645_v8  ;;  %v810_v53 = vrot.slane %v1702_v37, %v2168_v12 }
 0x301   :  { %v660_v2 = vsel %vm659_vm10, %v656_v47, %v658_v3  ;;  %v663_v62 = vsel %vm659_vm10, %v658_v3, %v652_v41  ;;  %v770_v41 = vrot.slane %v1701_v20, %v2181_v19 }
 0x302   :  { %v687_v6 = vmul.f32 %v670_v52, %v663_v62  ;;  %v690_v7 = vmul.f32 %v682_v56, %v660_v2  ;;  %1856 = vmatprep.subr.bf16.mxu0 %v1855_v0  ;;  %v814_v62 = vrot.slane %v1702_v37, %v2179_v17 }
 0x304   :  { %v1857_v9 = vpack.c.bf16 %v687_v6, %v643_v63  ;;  %v700_v10 = vpop.permute.xlu0 %699  ;;  %v698_v13 = vpop.permute.xlu1 %697  ;;  %v1871_v14 = vpack.c.bf16 %v690_v7, %v646_v5  ;;  %v818_v6 = vrot.slane %v1702_v37, %v2181_v19 }
 0x305   :  { %v706_v26 = vsel %vm703_vm11, %v696_v61, %v698_v13  ;;  %v705_v45 = vsel %vm703_vm11, %v698_v13, %v700_v10 }
 0x306   :  { %1858 = vmatpush1.bf16.msra.mxu0 %v1857_v9  ;;  %1872 = vmatprep.subr.bf16.mxu1 %v1871_v14  ;;  %v732_v38 = vmul.f32 %v718_v23, %v706_v26  ;;  %v733_v58 = vmul.f32 %v722_v42, %v705_v45  ;;  %v1704_v23 = vld [vmem:[%s2859_s3 + $0x40] ss:$8 sm:$0xf] }
 0x307   :  { %1874 = vmatpush1.bf16.msra.mxu1 %v1873_v16 }
 0x308   :  { %v740_v21 = vpop.permute.xlu0 %739  ;;  %v702_v22 = vpop.permute.xlu1 %701 }
 0x309   :  { %v704_v43 = vsel %vm703_vm11, %v700_v10, %v702_v22  ;;  %v707_v44 = vsel %vm703_vm11, %v702_v22, %v696_v61 }
 0x30a   :  { %v731_v54 = vmul.f32 %v714_v27, %v707_v44  ;;  %v734_v55 = vmul.f32 %v726_v32, %v704_v43 }
 0x30c   :  { %v744_v28 = vpop.permute.xlu0 %743  ;;  %v742_v29 = vpop.permute.xlu1 %741 }
 0x30d   :  { %v750_v35 = vsel %vm747_vm12, %v740_v21, %v742_v29  ;;  %v749_v39 = vsel %vm747_vm12, %v742_v29, %v744_v28 }
 0x30e   :  { %v776_v40 = vmul.f32 %v762_v24, %v750_v35  ;;  %v777_v50 = vmul.f32 %v766_v34, %v749_v39 }
 0x310   :  { %v788_v46 = vpop.permute.xlu0 %787  ;;  %v746_v47 = vpop.permute.xlu1 %745  ;;  %v1859_v48 = vpack.c.bf16 %v776_v40, %v732_v38  ;;  %v1877_v0 = vpack.c.bf16 %v777_v50, %v733_v58  ;;  %v902_v40 = vrot.slane %v1704_v23, %v2179_v17 }
 0x311   :  { %v748_v51 = vsel %vm747_vm12, %v744_v28, %v746_v47  ;;  %v751_v52 = vsel %vm747_vm12, %v746_v47, %v740_v21  ;;  %v898_v28 = vrot.slane %v1704_v23, %v2168_v12 }
 0x312   :  { %v775_v56 = vmul.f32 %v758_v36, %v751_v52  ;;  %v778_v57 = vmul.f32 %v770_v41, %v748_v51  ;;  %1860 = vmatprep.subr.bf16.mxu0 %v1859_v48  ;;  %v906_v41 = vrot.slane %v1704_v23, %v2181_v19 }
 0x314   :  { %v1861_v59 = vpack.c.bf16 %v775_v56, %v731_v54  ;;  %v792_v60 = vpop.permute.xlu0 %791  ;;  %v790_v61 = vpop.permute.xlu1 %789  ;;  %v1875_v3 = vpack.c.bf16 %v778_v57, %v734_v55 }
 0x315   :  { %v797_v1 = vsel %vm795_vm13, %v790_v61, %v792_v60  ;;  %v798_v2 = vsel %vm795_vm13, %v788_v46, %v790_v61 }
 0x316   :  { %v823_v63 = vmul.f32 %v806_v49, %v798_v2  ;;  %v824_v5 = vmul.f32 %v810_v53, %v797_v1  ;;  %1862 = vmatpush1.bf16.msra.mxu0 %v1861_v59  ;;  %1876 = vmatprep.subr.bf16.mxu1 %v1875_v3 }
 0x317   :  { %1878 = vmatpush1.bf16.msra.mxu1 %v1877_v0 }
 0x318   :  { %v1865_v7 = vpack.c.bf16 %v823_v63, %v2317_v25  ;;  %v832_v8 = vpop.permute.xlu0 %831  ;;  %v794_v9 = vpop.permute.xlu1 %793  ;;  %v1863_v10 = vpack.c.bf16 %v824_v5, %v2324_v30  ;;  %v1703_v30 = vld [vmem:[%s2859_s3 + $0x27] ss:$8 sm:$0xf] }
 0x319   :  { %v796_v13 = vsel %vm795_vm13, %v792_v60, %v794_v9  ;;  %v799_v14 = vsel %vm795_vm13, %v794_v9, %v788_v46  ;;  %v854_v27 = vrot.slane %v1703_v30, %v2168_v12  ;;  %v858_v34 = vrot.slane %v1703_v30, %v2179_v17  ;;  %v1705_v46 = vld [vmem:[%s2859_s3 + $0x41] ss:$8 sm:$0xf] }
 0x31a   :  { %v825_v16 = vmul.f32 %v814_v62, %v796_v13  ;;  %v826_v18 = vmul.f32 %v818_v6, %v799_v14  ;;  %1864 = vmatprep.subr.bf16.mxu0 %v1863_v10  ;;  %v862_v35 = vrot.slane %v1703_v30, %v2181_v19  ;;  %v938_v55 = vrot.slane %v1705_v46, %v2177_v15  ;;  %v963_v6 = vld [vmem:[%s2857_s1 + $0x8] sm:$0xff] }
 0x31b   :  { %1866 = vmatpush1.bf16.msra.mxu0 %v1865_v7  ;;  %v942_v56 = vrot.slane %v1705_v46, %v2168_v12  ;;  %v946_v12 = vrot.slane %v1705_v46, %v2179_v17  ;;  %v950_v5 = vrot.slane %v1705_v46, %v2181_v19  ;;  %v964_v17 = vld [vmem:[%s2857_s1 + $0x10] sm:$0xff]  ;;  %v1261_v46 = vld [vmem:[%s2860_s4 + $0x80] sm:$0xff] }
 0x31c   :  { %v1881_v20 = vpack.c.bf16 %v825_v16, %v2326_v31  ;;  %v836_v21 = vpop.permute.xlu0 %835  ;;  %v834_v22 = vpop.permute.xlu1 %833  ;;  %v1879_v25 = vpack.c.bf16 %v826_v18, %v2332_v33  ;;  %v850_v31 = vrot.slane %v1703_v30, %v2177_v15  ;;  %v894_v33 = vrot.slane %v1704_v23, %v2177_v15 }
 0x31d   :  { %v841_v29 = vsel %vm839_vm14, %v834_v22, %v836_v21  ;;  %v842_v32 = vsel %vm839_vm14, %v832_v8, %v834_v22 }
 0x31e   :  { %1880 = vmatprep.subr.bf16.mxu1 %v1879_v25  ;;  %v867_v42 = vmul.f32 %v850_v31, %v842_v32  ;;  %v868_v43 = vmul.f32 %v854_v27, %v841_v29 }
 0x31f   :  { %1882 = vmatpush1.bf16.msra.mxu1 %v1881_v20 }
 0x320   :  { %v876_v24 = vpop.permute.xlu0 %875  ;;  %v838_v26 = vpop.permute.xlu1 %837 }
 0x321   :  { %v840_v47 = vsel %vm839_vm14, %v836_v21, %v838_v26  ;;  %v843_v48 = vsel %vm839_vm14, %v838_v26, %v832_v8 }
 0x322   :  { %v869_v57 = vmul.f32 %v858_v34, %v840_v47  ;;  %v870_v58 = vmul.f32 %v862_v35, %v843_v48  ;;  %v1262_v47 = vld [vmem:[%s2860_s4 + $0x88] sm:$0xff]  ;;  %v1293_v48 = vld [vmem:[%s2860_s4 + $0x180] sm:$0xff] }
 0x324   :  { %v880_v36 = vpop.permute.xlu0 %879  ;;  %v878_v37 = vpop.permute.xlu1 %877 }
 0x325   :  { %v885_v38 = vsel %vm883_vm15, %v878_v37, %v880_v36  ;;  %v886_v39 = vsel %vm883_vm15, %v876_v24, %v878_v37 }
 0x326   :  { %v911_v44 = vmul.f32 %v894_v33, %v886_v39  ;;  %v912_v45 = vmul.f32 %v898_v28, %v885_v38 }
 0x328   :  { %v1869_v49 = vpack.c.bf16 %v911_v44, %v867_v42  ;;  %v920_v50 = vpop.permute.xlu0 %919  ;;  %v882_v51 = vpop.permute.xlu1 %881  ;;  %v1867_v52 = vpack.c.bf16 %v912_v45, %v868_v43 }
 0x329   :  { %v884_v53 = vsel %vm883_vm15, %v880_v36, %v882_v51  ;;  %v887_v54 = vsel %vm883_vm15, %v882_v51, %v876_v24  ;;  %v1245_v51 = vld [vmem:[%s2860_s4] sm:$0xff] }
 0x32a   :  { %v913_v59 = vmul.f32 %v902_v40, %v884_v53  ;;  %v914_v60 = vmul.f32 %v906_v41, %v887_v54  ;;  %1868 = vmatprep.subr.bf16.mxu0 %v1867_v52  ;;  %v1246_v52 = vld [vmem:[%s2860_s4 + $0x8] sm:$0xff] }
 0x32b   :  { %1870 = vmatpush1.bf16.msra.mxu0 %v1869_v49  ;;  %v1887_v49 = vpack.c.bf16 %v1262_v47, %v1261_v46  ;;  %v1889_v54 = vpack.c.bf16 %v1246_v52, %v1245_v51  ;;  %v1269_v46 = vld [vmem:[%s2860_s4 + $0xc0] sm:$0xff]  ;;  %v1270_v47 = vld [vmem:[%s2860_s4 + $0xc8] sm:$0xff] }
 0x32c   :  { %v1885_v61 = vpack.c.bf16 %v913_v59, %v869_v57  ;;  %v924_v3 = vpop.permute.xlu0 %923  ;;  %v922_v0 = vpop.permute.xlu1 %921  ;;  %v1883_v1 = vpack.c.bf16 %v914_v60, %v870_v58  ;;  %v1263_v57 = vld [vmem:[%s2860_s4 + $0x90] sm:$0xff]  ;;  %v1264_v59 = vld [vmem:[%s2860_s4 + $0x98] sm:$0xff]  ;;  %v1903_v52 = vpack.c.bf16 %v1270_v47, %v1269_v46 }
 0x32d   :  { %v929_v2 = vsel %vm927_vm0, %v922_v0, %v924_v3  ;;  %v930_v62 = vsel %vm927_vm0, %v920_v50, %v922_v0  ;;  %v1295_v60 = vld [vmem:[%s2860_s4 + $0x190] sm:$0xff] }
 0x32e   :  { %v955_v63 = vmul.f32 %v938_v55, %v930_v62  ;;  %v956_v15 = vmul.f32 %v942_v56, %v929_v2  ;;  %1884 = vmatprep.subr.bf16.mxu1 %v1883_v1  ;;  %v1277_v55 = vld [vmem:[%s2860_s4 + $0x100] sm:$0xff]  ;;  %v1278_v56 = vld [vmem:[%s2860_s4 + $0x108] sm:$0xff]  ;;  %v1247_v1 = vld [vmem:[%s2860_s4 + $0x10] sm:$0xff] }
 0x32f   :  { %1886 = vmatpush1.bf16.msra.mxu1 %v1885_v61  ;;  %v1921_v58 = vpack.c.bf16 %v1278_v56, %v1277_v55  ;;  %v1296_v61 = vld [vmem:[%s2860_s4 + $0x198] sm:$0xff]  ;;  %v1279_v62 = vld [vmem:[%s2860_s4 + $0x110] sm:$0xff]  ;;  %v1285_v55 = vld [vmem:[%s2860_s4 + $0x140] sm:$0xff] }
 0x330   :  { %1035 = vmatprep.subr.mxu0 %v956_v15  ;;  %v926_v7 = vpop.permute.xlu1 %925  ;;  %v1923_v0 = vpack.c.bf16 %v1296_v61, %v1295_v60  ;;  %v1248_v2 = vld [vmem:[%s2860_s4 + $0x18] sm:$0xff]  ;;  %v1303_v60 = vld [vmem:[%s2860_s4 + $0x1d0] sm:$0xff] }
 0x331   :  { %v928_v8 = vsel %vm927_vm0, %v924_v3, %v926_v7  ;;  %v931_v9 = vsel %vm927_vm0, %v926_v7, %v920_v50  ;;  %1036 = vmatpush1.msra.mxu0 %v955_v63  ;;  %v1294_v50 = vld [vmem:[%s2860_s4 + $0x188] sm:$0xff]  ;;  %v1891_v3 = vpack.c.bf16 %v1264_v59, %v1263_v57  ;;  %v1893_v63 = vpack.c.bf16 %v1248_v2, %v1247_v1  ;;  %v1280_v15 = vld [vmem:[%s2860_s4 + $0x118] sm:$0xff]  ;;  %v1255_v2 = vld [vmem:[%s2860_s4 + $0x50] sm:$0xff] }
 0x332   :  { %v957_v10 = vmul.f32 %v946_v12, %v928_v8  ;;  %v958_v13 = vmul.f32 %v950_v5, %v931_v9  ;;  %1706 = vmatmul.mubr.msk.f32.vlgmr.msra.gmra.mrb[2].mxu0 %vm425_vm8, %v963_v6  ;;  %v1919_v53 = vpack.c.bf16 %v1294_v50, %v1293_v48  ;;  %1888 = vmatprep.subr.bf16.mxu0 %v1887_v49  ;;  %v1265_v12 = vld [vmem:[%s2860_s4 + $0xa0] sm:$0xff]  ;;  %v1266_v5 = vld [vmem:[%s2860_s4 + $0xa8] sm:$0xff]  ;;  %v1272_v59 = vld [vmem:[%s2860_s4 + $0xd8] sm:$0xff] }
 0x333   :  { %1089 = vmatprep.mubr.f32.mxu0 %v2057_v4  ;;  %1890 = vmatpush3.bf16.msra.mxu0 %v1889_v54  ;;  %v1895_v7 = vpack.c.bf16 %v1266_v5, %v1265_v12  ;;  %v1297_v8 = vld [vmem:[%s2860_s4 + $0x1a0] sm:$0xff]  ;;  %v1298_v9 = vld [vmem:[%s2860_s4 + $0x1a8] sm:$0xff]  ;;  %v1304_v61 = vld [vmem:[%s2860_s4 + $0x1d8] sm:$0xff] }
 0x334   :  { %1112 = vmatprep.subr.mxu1 %v958_v13  ;;  %1892 = vmatprep.subr.bf16.mxu0 %v1891_v3  ;;  %v1927_v13 = vpack.c.bf16 %v1298_v9, %v1297_v8  ;;  %v1301_v48 = vld [vmem:[%s2860_s4 + $0x1c0] sm:$0xff]  ;;  %v1302_v49 = vld [vmem:[%s2860_s4 + $0x1c8] sm:$0xff]  ;;  %v1288_v12 = vld [vmem:[%s2860_s4 + $0x158] sm:$0xff] }
 0x335   :  { %1113 = vmatpush1.msra.mxu1 %v957_v10  ;;  %v1249_v10 = vld [vmem:[%s2860_s4 + $0x20] sm:$0xff]  ;;  %v1254_v54 = vld [vmem:[%s2860_s4 + $0x48] sm:$0xff]  ;;  %v1935_v56 = vpack.c.bf16 %v1302_v49, %v1301_v48  ;;  %v1291_v48 = vld [vmem:[%s2860_s4 + $0x170] sm:$0xff] }
 0x336   :  { %1707 = vmatmul.mubr.msk.f32.gmra.mrb[4].mxu0 %vm425_vm8, %v964_v17  ;;  %1708 = vmatmul.mubr.msk.f32.vlgmr.msra.gmra.mrb[2].mxu1 %vm425_vm8, %v963_v6  ;;  %v1925_v6 = vpack.c.bf16 %v1280_v15, %v1279_v62  ;;  %v1286_v57 = vld [vmem:[%s2860_s4 + $0x148] sm:$0xff]  ;;  %v1256_v62 = vld [vmem:[%s2860_s4 + $0x58] sm:$0xff]  ;;  %v1939_v15 = vpack.c.bf16 %v1304_v61, %v1303_v60  ;;  %v1273_v5 = vld [vmem:[%s2860_s4 + $0xe0] sm:$0xff] }
 0x337   :  { %1166 = vmatprep.mubr.f32.mxu1 %v2057_v4  ;;  %1920 = vmatprep.subr.bf16.mxu1 %v1919_v53  ;;  %v1253_v53 = vld [vmem:[%s2860_s4 + $0x40] sm:$0xff]  ;;  %v1306_v8 = vld [vmem:[%s2860_s4 + $0x1e8] sm:$0xff]  ;;  %v1909_v9 = vpack.c.bf16 %v1256_v62, %v1255_v2  ;;  %v1292_v49 = vld [vmem:[%s2860_s4 + $0x178] sm:$0xff] }
 0x338   :  { %1922 = vmatpush3.bf16.msra.mxu1 %v1921_v58  ;;  %1894 = vmatpush3.bf16.msra.mxu0 %v1893_v63  ;;  %v1271_v58 = vld [vmem:[%s2860_s4 + $0xd0] sm:$0xff]  ;;  %v1905_v3 = vpack.c.bf16 %v1254_v54, %v1253_v53 }
 0x339   :  { %1924 = vmatprep.subr.bf16.mxu1 %v1923_v0  ;;  %1896 = vmatprep.subr.bf16.mxu0 %v1895_v7  ;;  %v1937_v0 = vpack.c.bf16 %v1286_v57, %v1285_v55  ;;  %v1907_v1 = vpack.c.bf16 %v1272_v59, %v1271_v58  ;;  %v1287_v63 = vld [vmem:[%s2860_s4 + $0x150] sm:$0xff]  ;;  %v1305_v7 = vld [vmem:[%s2860_s4 + $0x1e0] sm:$0xff] }
 0x33a   :  { %1709 = vmatmul.mubr.msk.f32.gmra.mrb[4].mxu1 %vm425_vm8, %v964_v17  ;;  %v1250_v17 = vld [vmem:[%s2860_s4 + $0x28] sm:$0xff] }
 0x33c   :  { %1926 = vmatpush3.bf16.msra.mxu1 %v1925_v6  ;;  %v1274_v6 = vld [vmem:[%s2860_s4 + $0xe8] sm:$0xff] }
 0x33d   :  { %v1006_v19 = vpop.permute.xlu0 %1005  ;;  %1928 = vmatprep.subr.bf16.mxu1 %v1927_v13  ;;  %v1911_v13 = vpack.c.bf16 %v1274_v6, %v1273_v5 }
 0x341   :  { %v1011_v21 = vpop.permute.xlu1 %1010 }
 0x405   :  { %v1085_v14 = vpop.f32.mrb[2].mxu0 }
 0x406   :  { %v2521_v16 = vadd.f32 %v1085_v14, %v1006_v19  ;;  %v1087_v18 = vpop.f32.mrb[3].mxu0  ;;  %v1282_v14 = vld [vmem:[%s2860_s4 + $0x128] sm:$0xff] }
 0x407   :  { %v2523_v20 = vadd.f32 %v1087_v18, %v1006_v19  ;;  %v1897_v18 = vpack.c.bf16 %v1250_v17, %v1249_v10  ;;  %v1941_v10 = vpack.c.bf16 %v1288_v12, %v1287_v63  ;;  %v1257_v17 = vld [vmem:[%s2860_s4 + $0x60] sm:$0xff] }
 0x408   :  { %v1173_v22 = vmax.f32 %v2521_v16, 0.0 }
 0x409   :  { %v1174_v25 = vmax.f32 %v2523_v20, 0.0  ;;  %v1091_v30 = vpop.f32.mrb[4].mxu0  ;;  %v1162_v23 = vpop.f32.mrb[2].mxu1  ;;  %1898 = vmatpush3.bf16.msra.mxu0 %v1897_v18  ;;  %v1289_v18 = vld [vmem:[%s2860_s4 + $0x160] sm:$0xff] }
 0x40a   :  { %v2527_v24 = vadd.f32 %v1162_v23, %v1006_v19  ;;  %v1093_v26 = vpop.f32.mrb[5].mxu0  ;;  %v1164_v31 = vpop.f32.mrb[3].mxu1  ;;  %v2529_v27 = vadd.f32 %v1091_v30, %v1011_v21  ;;  %v1268_v30 = vld [vmem:[%s2860_s4 + $0xb8] sm:$0xff]  ;;  %v1299_v23 = vld [vmem:[%s2860_s4 + $0x1b0] sm:$0xff] }
 0x40b   :  { %v1984_v33 = vpack.i.bf16 %v1174_v25, %v1173_v22  ;;  %v2535_v28 = vadd.f32 %v1164_v31, %v1006_v19  ;;  %v2537_v29 = vadd.f32 %v1093_v26, %v1011_v21  ;;  %v1281_v19 = vld [vmem:[%s2860_s4 + $0x120] sm:$0xff] }
 0x40c   :  { %v1175_v32 = vmax.f32 %v2527_v24, 0.0  ;;  %v1177_v34 = vmax.f32 %v2529_v27, 0.0  ;;  %v1929_v26 = vpack.c.bf16 %v1282_v14, %v1281_v19  ;;  %v1258_v19 = vld [vmem:[%s2860_s4 + $0x68] sm:$0xff]  ;;  %v1943_v14 = vpack.c.bf16 %v1306_v8, %v1305_v7  ;;  %v1463_v27 = vld [vmem:[%s2858_s2 + $0x18] sm:$0xff] }
 0x40d   :  { %v1176_v35 = vmax.f32 %v2535_v28, 0.0  ;;  %1985 = vrot.lane.b32.xlu0 %v1984_v33, %s2064_s6  ;;  %v1168_v36 = vpop.f32.mrb[4].mxu1  ;;  %v1178_v37 = vmax.f32 %v2537_v29, 0.0  ;;  %v1300_v33 = vld [vmem:[%s2860_s4 + $0x1b8] sm:$0xff]  ;;  %v1464_v29 = vld [vmem:[%s2858_s2 + $0x20] sm:$0xff] }
 0x40e   :  { %v2544_v38 = vadd.f32 %v1168_v36, %v1011_v21  ;;  %v1170_v39 = vpop.f32.mrb[5].mxu1  ;;  %v1251_v36 = vld [vmem:[%s2860_s4 + $0x30] sm:$0xff]  ;;  %1930 = vmatpush3.bf16.msra.mxu1 %v1929_v26 }
 0x40f   :  { %v1989_v40 = vpack.i.bf16 %v1176_v35, %v1175_v32  ;;  %v2550_v41 = vadd.f32 %v1170_v39, %v1011_v21  ;;  %v1994_v42 = vpack.i.bf16 %v1178_v37, %v1177_v34  ;;  %v1267_v21 = vld [vmem:[%s2860_s4 + $0xb0] sm:$0xff]  ;;  %v1252_v39 = vld [vmem:[%s2860_s4 + $0x38] sm:$0xff] }
 0x410   :  { %v1179_v43 = vmax.f32 %v2544_v38, 0.0  ;;  %v1899_v31 = vpack.c.bf16 %v1268_v30, %v1267_v21  ;;  %v1901_v50 = vpack.c.bf16 %v1252_v39, %v1251_v36  ;;  %v1290_v21 = vld [vmem:[%s2860_s4 + $0x168] sm:$0xff]  ;;  %v1913_v30 = vpack.c.bf16 %v1258_v19, %v1257_v17  ;;  %v1275_v26 = vld [vmem:[%s2860_s4 + $0xf0] sm:$0xff]  ;;  %v1308_v39 = vld [vmem:[%s2860_s4 + $0x1f8] sm:$0xff] }
 0x411   :  { %v1180_v44 = vmax.f32 %v2550_v41, 0.0  ;;  %1990 = vrot.lane.b32.xlu1 %v1989_v40, %s2064_s6  ;;  %1995 = vrot.lane.b32.xlu0 %v1994_v42, %s2064_s6  ;;  %v1931_v40 = vpack.c.bf16 %v1300_v33, %v1299_v23  ;;  %v1283_v42 = vld [vmem:[%s2860_s4 + $0x130] sm:$0xff]  ;;  %v1945_v23 = vpack.c.bf16 %v1290_v21, %v1289_v18  ;;  %v1590_v38 = vld [vmem:[%s2858_s2 + $0x38] sm:$0xff] }
 0x412   :  { %1900 = vmatprep.subr.bf16.mxu0 %v1899_v31  ;;  %v1276_v31 = vld [vmem:[%s2860_s4 + $0xf8] sm:$0xff]  ;;  %v1307_v33 = vld [vmem:[%s2860_s4 + $0x1f0] sm:$0xff] }
 0x413   :  { %v1999_v45 = vpack.i.bf16 %v1180_v44, %v1179_v43  ;;  %1932 = vmatprep.subr.bf16.mxu1 %v1931_v40  ;;  %1902 = vmatpush3.bf16.msra.mxu0 %v1901_v50  ;;  %v1915_v36 = vpack.c.bf16 %v1276_v31, %v1275_v26  ;;  %v1259_v40 = vld [vmem:[%s2860_s4 + $0x70] sm:$0xff]  ;;  %v1947_v46 = vpack.c.bf16 %v1308_v39, %v1307_v33 }
 0x414   :  { %1904 = vmatprep.subr.bf16.mxu0 %v1903_v52  ;;  %v1949_v52 = vpack.c.bf16 %v1292_v49, %v1291_v48 }
 0x415   :  { %2000 = vrot.lane.b32.xlu1 %v1999_v45, %s2064_s6  ;;  %v1284_v45 = vld [vmem:[%s2860_s4 + $0x138] sm:$0xff] }
 0x416   :  { %v1933_v51 = vpack.c.bf16 %v1284_v45, %v1283_v42  ;;  %v1260_v42 = vld [vmem:[%s2860_s4 + $0x78] sm:$0xff] }
 0x417   :  { %1906 = vmatpush3.bf16.msra.mxu0 %v1905_v3  ;;  %v1917_v47 = vpack.c.bf16 %v1260_v42, %v1259_v40 }
 0x418   :  { %1934 = vmatpush3.bf16.msra.mxu1 %v1933_v51  ;;  %1908 = vmatprep.subr.bf16.mxu0 %v1907_v1 }
 0x419   :  { %1936 = vmatprep.subr.bf16.mxu1 %v1935_v56 }
 0x41b   :  { %1910 = vmatpush3.bf16.msra.mxu0 %v1909_v9 }
 0x41c   :  { %1938 = vmatpush3.bf16.msra.mxu1 %v1937_v0  ;;  %1912 = vmatprep.subr.bf16.mxu0 %v1911_v13 }
 0x41d   :  { %1940 = vmatprep.subr.bf16.mxu1 %v1939_v15 }
 0x41f   :  { %1914 = vmatpush3.bf16.msra.mxu0 %v1913_v30 }
 0x420   :  { %1942 = vmatpush3.bf16.msra.mxu1 %v1941_v10  ;;  %1916 = vmatprep.subr.bf16.mxu0 %v1915_v36 }
 0x421   :  { %1944 = vmatprep.subr.bf16.mxu1 %v1943_v14 }
 0x423   :  { %1918 = vmatpush3.bf16.msra.mxu0 %v1917_v47 }
 0x424   :  { %1946 = vmatpush3.bf16.msra.mxu1 %v1945_v23 }
 0x425   :  { %1948 = vmatprep.subr.bf16.mxu1 %v1947_v46 }
 0x428   :  { %1950 = vmatpush3.bf16.msra.mxu1 %v1949_v52 }
 0x47f   :  { %v1986_v45 = vpop.permute.xlu0 %1985 }
 0x480   :  { %v1988_v50 = vunpack.i.h.bf16 %v1986_v45  ;;  %v1987_v51 = vunpack.i.l.bf16 %v1986_v45 }
 0x482   :  { %v1201_v53 = vsel %vm795_vm13, %v1987_v51, %v1988_v50 }
 0x483   :  { %v1996_v54 = vpop.permute.xlu0 %1995  ;;  %v1991_v55 = vpop.permute.xlu1 %1990  ;;  %v1205_v0 = vmax.f32 %v1173_v22, %v1201_v53  ;;  %v1459_v53 = vld [vmem:[%s2857_s1 + $0x18] sm:$0xff] }
 0x484   :  { %v1998_v56 = vunpack.i.h.bf16 %v1996_v54  ;;  %v1997_v57 = vunpack.i.l.bf16 %v1996_v54  ;;  %v1993_v58 = vunpack.i.h.bf16 %v1991_v55  ;;  %v1992_v59 = vunpack.i.l.bf16 %v1991_v55 }
 0x486   :  { %v1203_v60 = vsel %vm795_vm13, %v1993_v58, %v1987_v51  ;;  %v1197_v61 = vsel %vm795_vm13, %v1992_v59, %v1993_v58  ;;  %v1199_v3 = vsel %vm795_vm13, %v1988_v50, %v1992_v59  ;;  %v1202_v1 = vsel %vm795_vm13, %v1997_v57, %v1998_v56 }
 0x487   :  { %v2001_v2 = vpop.permute.xlu1 %2000  ;;  %v1206_v62 = vmax.f32 %v1174_v25, %v1199_v3  ;;  %v1207_v63 = vmax.f32 %v1175_v32, %v1197_v61  ;;  %v1208_v15 = vmax.f32 %v1176_v35, %v1203_v60  ;;  %v1209_v25 = vmax.f32 %v1177_v34, %v1202_v1  ;;  %v1465_v34 = vld [vmem:[%s2858_s2 + $0x28] sm:$0xff] }
 0x488   :  { %v2003_v12 = vunpack.i.h.bf16 %v2001_v2  ;;  %v2002_v5 = vunpack.i.l.bf16 %v2001_v2 }
 0x489   :  { %v2004_v6 = vpack.i.bf16 %v1206_v62, %v1205_v0  ;;  %v2009_v7 = vpack.i.bf16 %v1208_v15, %v1207_v63 }
 0x48a   :  { %v1204_v16 = vsel %vm795_vm13, %v2003_v12, %v1997_v57  ;;  %v1198_v22 = vsel %vm795_vm13, %v2002_v5, %v2003_v12  ;;  %v1200_v20 = vsel %vm795_vm13, %v1998_v56, %v2002_v5  ;;  %v1461_v12 = vld [vmem:[%s2857_s1 + $0x28] sm:$0xff]  ;;  %v1462_v5 = vld [vmem:[%s2857_s1 + $0x30] sm:$0xff] }
 0x48b   :  { %2005 = vrot.lane.b32.xlu0 %v2004_v6, %s2066_s8  ;;  %2010 = vrot.lane.b32.xlu1 %v2009_v7, %s2066_s8  ;;  %v1210_v24 = vmax.f32 %v1178_v37, %v1200_v20  ;;  %v1211_v28 = vmax.f32 %v1179_v43, %v1198_v22  ;;  %v1212_v32 = vmax.f32 %v1180_v44, %v1204_v16  ;;  %v1466_v37 = vld [vmem:[%s2858_s2 + $0x30] sm:$0xff]  ;;  %v2068_v6 = vmov 0.0|0.0  }
 0x48c   :  { %1955 = vmatprep.subr.bf16.mxu1 %v2068_v6 }
 0x48d   :  { %v2014_v35 = vpack.i.bf16 %v1210_v24, %v1209_v25  ;;  %v2019_v8 = vpack.i.bf16 %v1212_v32, %v1211_v28 }
 0x48f   :  { %2015 = vrot.lane.b32.xlu0 %v2014_v35, %s2066_s8  ;;  %2020 = vrot.lane.b32.xlu1 %v2019_v8, %s2066_s8 }
 0x493   :  { %1469 = vperm.xlu0 %1982, %v1463_v27   ;;  %1474 = vperm.xlu1 %1983, %v1464_v29  }
 0x497   :  { %1479 = vperm.xlu0 %1982, %v1465_v34   ;;  %1484 = vperm.xlu1 %1983, %v1466_v37  }
 0x49b   :  { %1593 = vperm.xlu0 %1982, %v1590_v38  }
 0x4fd   :  { %v2006_v41 = vpop.permute.xlu0 %2005  ;;  %v2011_v43 = vpop.permute.xlu1 %2010 }
 0x4fe   :  { %v2008_v44 = vunpack.i.h.bf16 %v2006_v41  ;;  %v2007_v9 = vunpack.i.l.bf16 %v2006_v41  ;;  %v2013_v10 = vunpack.i.h.bf16 %v2011_v43  ;;  %v2012_v13 = vunpack.i.l.bf16 %v2011_v43 }
 0x500   :  { %v1233_v17 = vsel %vm883_vm15, %v2007_v9, %v2008_v44  ;;  %v1229_v19 = vsel %vm883_vm15, %v2012_v13, %v2013_v10  ;;  %v1231_v14 = vsel %vm883_vm15, %v2008_v44, %v2012_v13  ;;  %v1235_v18 = vsel %vm883_vm15, %v2013_v10, %v2007_v9  ;;  %v1589_v44 = vld [vmem:[%s2857_s1 + $0x38] sm:$0xff] }
 0x501   :  { %v1237_v21 = vmax.f32 %v1205_v0, %v1233_v17  ;;  %v1239_v30 = vmax.f32 %v1207_v63, %v1229_v19  ;;  %v2016_v23 = vpop.permute.xlu0 %2015  ;;  %v2021_v26 = vpop.permute.xlu1 %2020  ;;  %v1238_v31 = vmax.f32 %v1206_v62, %v1231_v14  ;;  %v1240_v33 = vmax.f32 %v1208_v15, %v1235_v18  ;;  %v1460_v15 = vld [vmem:[%s2857_s1 + $0x20] sm:$0xff] }
 0x502   :  { %v2018_v36 = vunpack.i.h.bf16 %v2016_v23  ;;  %v2017_v39 = vunpack.i.l.bf16 %v2016_v23  ;;  %v2023_v40 = vunpack.i.h.bf16 %v2021_v26  ;;  %v2022_v42 = vunpack.i.l.bf16 %v2021_v26 }
 0x503   :  { %1373 = vmatprep.mubr.f32.mxu0 %v1238_v31  ;;  %1448 = vmatprep.mubr.f32.mxu1 %v1240_v33 }
 0x504   :  { %1374 = vmatmul.mubr.f32.vlgmr.msra.gmra.mrb[6].mxu0 %v1237_v21  ;;  %1449 = vmatmul.mubr.f32.vlgmr.msra.gmra.mrb[6].mxu1 %v1239_v30  ;;  %v1232_v45 = vsel %vm883_vm15, %v2018_v36, %v2022_v42  ;;  %v1236_v46 = vsel %vm883_vm15, %v2023_v40, %v2017_v39  ;;  %v1234_v47 = vsel %vm883_vm15, %v2017_v39, %v2018_v36 }
 0x505   :  { %v1242_v48 = vmax.f32 %v1210_v24, %v1232_v45  ;;  %v1244_v49 = vmax.f32 %v1212_v32, %v1236_v46  ;;  %v1241_v50 = vmax.f32 %v1209_v25, %v1234_v47  ;;  %v1230_v51 = vsel %vm883_vm15, %v2022_v42, %v2023_v40 }
 0x506   :  { %v1243_v52 = vmax.f32 %v1211_v28, %v1230_v51 }
 0x507   :  { %1378 = vmatprep.mubr.f32.mxu0 %v1242_v48  ;;  %1453 = vmatprep.mubr.f32.mxu1 %v1244_v49 }
 0x508   :  { %1379 = vmatmul.mubr.f32.gmra.mrb[8].mxu0 %v1241_v50  ;;  %1454 = vmatmul.mubr.f32.gmra.mrb[8].mxu1 %v1243_v52 }
 0x509   :  { %1806 = vmatprep.mubr.msk.f32.mxu0 %vm1487_vm1, %v1459_v53  ;;  %1820 = vmatprep.mubr.msk.f32.mxu1 %vm2069_vm2, %v2057_v4 }
 0x512   :  { %v1475_v7 = vpop.permute.xlu1 %1474  ;;  %v1470_v16 = vpop.permute.xlu0 %1469 }
 0x516   :  { %v1485_v32 = vpop.permute.xlu1 %1484  ;;  %v1480_v27 = vpop.permute.xlu0 %1479 }
 0x51a   :  { %v1594_v9 = vpop.permute.xlu0 %1593 }
 0x5d7   :  { %v1747_v54 = vpop.f32.mrb[6].mxu0  ;;  %v1785_v55 = vpop.f32.mrb[6].mxu1 }
 0x5d8   :  { %v1748_v56 = vpop.f32.mrb[7].mxu0  ;;  %v1786_v57 = vpop.f32.mrb[7].mxu1 }
 0x5d9   :  { %v1749_v58 = vadd.f32 %v1748_v56, %v1747_v54  ;;  %v1787_v59 = vadd.f32 %v1786_v57, %v1785_v55 }
 0x5db   :  { %v1451_v11 = vadd.f32 %v1787_v59, %v1749_v58  ;;  %v1750_v60 = vpop.f32.mrb[8].mxu0  ;;  %v1788_v61 = vpop.f32.mrb[8].mxu1 }
 0x5dc   :  { %v1751_v3 = vpop.f32.mrb[9].mxu0  ;;  %v1789_v0 = vpop.f32.mrb[9].mxu1 }
 0x5dd   :  { %v1752_v1 = vadd.f32 %v1751_v3, %v1750_v60  ;;  %v1790_v2 = vadd.f32 %v1789_v0, %v1788_v61 }
 0x5df   :  { %v1456_v62 = vadd.f32 %v1790_v2, %v1752_v1 }
 0x5e1   :  { %v1951_v63 = vpack.c.bf16 %v1456_v62, %v1451_v11 }
 0x5e3   :  { %1952 = vmatprep.subr.bf16.mxu0 %v1951_v63 }
 0x5e4   :  { %1954 = vmatpush3.bf16.msra.mxu0 %v1951_v63 }
 0x5e7   :  { %1807 = vmatmul.mubr.msk.f32.vlgmr.msra.gmra.mrb[10].mxu0 %vm1487_vm1, %v1460_v15 }
 0x5e8   :  { %1809 = vmatprep.mubr.msk.f32.mxu0 %vm1487_vm1, %v1461_v12 }
 0x5eb   :  { %1810 = vmatmul.mubr.msk.f32.gmra.mrb[12].mxu0 %vm1487_vm1, %v1462_v5 }
 0x6ba   :  { %v1808_v22 = vpop.f32.mrb[10].mxu0 }
 0x6bb   :  { %v1572_v20 = vadd.f32 %v1808_v22, %v1475_v7  ;;  %v1566_v25 = vpop.f32.mrb[11].mxu0 }
 0x6bc   :  { %v1567_v24 = vadd.f32 %v1566_v25, %v1470_v16 }
 0x6bd   :  { %v1586_v28 = vmax.f32 %v1572_v20, 0.0 }
 0x6be   :  { %v1585_v35 = vmax.f32 %v1567_v24, 0.0  ;;  %v1811_v8 = vpop.f32.mrb[12].mxu0 }
 0x6bf   :  { %v1582_v29 = vadd.f32 %v1811_v8, %v1485_v32  ;;  %v1576_v34 = vpop.f32.mrb[13].mxu0 }
 0x6c0   :  { %v1956_v37 = vpack.c.bf16 %v1586_v28, %v1585_v35  ;;  %v1577_v38 = vadd.f32 %v1576_v34, %v1480_v27 }
 0x6c1   :  { %v1588_v41 = vmax.f32 %v1582_v29, 0.0 }
 0x6c2   :  { %v1587_v43 = vmax.f32 %v1577_v38, 0.0  ;;  %1957 = vmatpush3.bf16.msra.mxu1 %v1956_v37 }
 0x6c3   :  { %1958 = vmatprep.subr.bf16.mxu1 %v2068_v6 }
 0x6c4   :  { %v1959_v4 = vpack.c.bf16 %v1588_v41, %v1587_v43 }
 0x6c6   :  { %1960 = vmatpush3.bf16.msra.mxu1 %v1959_v4 }
 0x6c9   :  { %1821 = vmatmul.mubr.msk.f32.vlgmr.msra.gmra.mrb[10].mxu1 %vm1596_vm3, %v1589_v44 }
 0x79c   :  { %v1666_v10 = vpop.f32.mrb[10].mxu1 }
 0x79d   :  { %v1667_v13 = vadd.f32 %v1666_v10, %v1594_v9  ;;  %v1822_v17 = vpop.f32.mrb[11].mxu1 }
 0x79f   :  { %2024 = vtanh.f32 %v1667_v13 }
 0x7a9   :  { %v2025_v19 = vpop.eup %2024 }
 0x7aa   :  { %v1671_v14 = vmul.f32 0.6, %v2025_v19 }
 0x7ac   :  { %v1672_v18 = vadd.f32 0.6, %v1671_v14 }
 0x7ae   :  { %1674 = vst.msk [vmem:[#allocation3] sm:$0x3] %vm1673_vm4, %v1672_v18 }
 0x7af   :  { %2037 = shalt.err (!%p2034_p4)
}
 0x7b0   :  { %s2038_s27 = scalar_lea.hbm %s2861_s5, 32 }
 0x7b1   :  { %p2039_p5 = scmp.ne.s32.totalorder %s2861_s5, %s2038_s27  ;;  %p2042_p6 = scmp.lt.u32.totalorder %s2038_s27, %s2861_s5 }
 0x7b3   :  { %p2044_p7 = pnand %p2042_p6, %p2039_p5 }
 0x7b5   :  { %2047 = shalt.err (!%p2044_p7)
}
 0x7b6   :  { %1684 = dma.vmem_to_hbm [thread:$0]  %s1682_s24, 32, %s2861_s5, [#allocation4]  }
 0x7b7   :  { %2048 = dma.done.wait [#allocation4], 32  }
 0x7b8   :  { %2049 = vsyncadd [#allocation4], 4294967264 }
 0x7b9   :  { %1688 = vsyncpa [#allocation4], 1 }

</bundles_post_ra>
